<compile_context>
chip_gen: v5e
topology: v5e:2x2
jax: 0.10.0
libtpu: 0.0.40
codegen_flags: <defaults>
</compile_context>

<pallas_src>
import numpy as np
import jax
import jax.numpy as jnp
from jax.experimental import pallas as pl
from jax.experimental.pallas import tpu as pltpu


def _dft_matrices(N, modes):
    """Ortho-normalized truncated rfft / irfft matrices as real arrays."""
    n = jnp.arange(N, dtype=jnp.float32)[:, None]        # (N, 1)
    k = jnp.arange(modes, dtype=jnp.float32)[None, :]    # (1, modes)
    ang = 2.0 * jnp.pi * n * k / N                       # (N, modes)
    inv_sqrt_n = 1.0 / np.sqrt(float(N))
    # forward: X_k = (1/sqrt(N)) sum_n x_n (cos - i sin)
    fr = jnp.cos(ang) * inv_sqrt_n                       # (N, modes)
    fi = -jnp.sin(ang) * inv_sqrt_n                      # (N, modes)
    # inverse (Hermitian-symmetric reconstruction); rows k=0 (and N/2) get c=1
    kk = jnp.arange(modes)
    c = jnp.where((kk == 0) | ((N % 2 == 0) & (kk == N // 2)), 1.0, 2.0).astype(jnp.float32)
    gr = c[:, None] * jnp.cos(ang.T) * inv_sqrt_n        # (modes, N)
    gi = -c[:, None] * jnp.sin(ang.T) * inv_sqrt_n       # (modes, N)
    return fr, fi, gr, gi


def _make_kernel(modes, width, out_ch, bb, cb, n_pad):
    m = modes
    n_chunks = bb // cb
    cw = cb * width
    co = cb * out_ch

    def kernel(x_ref, fcat_ref, vcat_ref, bcat_ref, rep_ref, gcat_ref,
               w5k_ref, b5_ref, out_ref):
        f32 = jnp.float32

        # (1) truncated ortho rfft of the raw input: ONE MXU matmul with M = bb.
        #     sb[b, :] = [Re S[b, 0:m] | Im S[b, 0:m]]
        sb = jnp.dot(x_ref[...], fcat_ref[...], preferred_element_type=f32)    # (bb, 2m)

        vcat = vcat_ref[...]                     # (cw, 2m)  [vr | vi] (tiled over cb)
        bcat = bcat_ref[...]                     # (cw, 2m)  [br | bi] spectral bias
        vr, vi = vcat[:, :m], vcat[:, m:]
        rep = rep_ref[...]                       # (cw, cb)  sample -> width-rows replication
        gcat = gcat_ref[...]                     # (2m, n_pad)
        w5k = w5k_ref[...]                       # (co, cw)  kron(I_cb, W5)
        b5 = b5_ref[...]                         # (co, 1)

        # (2) per-chunk (cb = 8 samples): mixing + irfft + ReLU + conv5.
        #     All weights are bb-independent; conv5 MACs scale linearly in bb.
        for j in range(n_chunks):
            s_c = sb[j * cb:(j + 1) * cb, :]                                   # (cb, 2m)
            # replicate each sample's spectrum across its `width` output rows
            srep = jnp.dot(rep, s_c, preferred_element_type=f32)              # (cw, 2m)
            sr, si = srep[:, :m], srep[:, m:]
            # rank-1-collapsed complex channel mixing (elementwise, VPU)
            zr = sr * vr - si * vi
            zi = sr * vi + si * vr
            zcat = jnp.concatenate([zr, zi], axis=1) + bcat                    # (cw, 2m)
            # truncated ortho irfft as ONE matmul (M = cb*width), then ReLU
            y = jnp.dot(zcat, gcat, preferred_element_type=f32)                # (cw, n_pad)
            y = jnp.maximum(y, 0.0)
            # conv5 (1x1, width -> out_ch): M = cb*out_ch, K = cb*width on MXU
            o = jnp.dot(w5k, y, preferred_element_type=f32) + b5               # (co, n_pad)
            out_ref[j * co:(j + 1) * co, :] = o

    return kernel


def fno_forward(x, params, *, batch_block=128):
    """x: (B, N) float32. Returns (B, out_channels, N) float32."""
    w1, b1, w2, b2, wr, wi, w5, b5 = params
    B, N = x.shape
    width = w2.shape[0]
    out_ch = w5.shape[0]
    modes = wr.shape[2]
    assert modes <= N // 2 + 1, "modes must not exceed N//2 + 1"

    f32 = jnp.float32
    cb = 8                                               # inner chunk (fixed, bb-independent)
    bb = min(batch_block, ((B + cb - 1) // cb) * cb)     # batch block: multiple of 8, <= 128
    assert bb % cb == 0
    b_pad = ((B + bb - 1) // bb) * bb
    n_pad = ((N + 127) // 128) * 128                     # lane-dense spatial dim
    grid = (b_pad // bb,)

    # ---- input padding (batch to multiple of bb, N to multiple of 128) -------
    xp = jnp.zeros((b_pad, n_pad), f32).at[:B, :N].set(x.astype(f32))

    # ---- weight-only preprocessing (XLA, once) --------------------------------
    fr, fi, gr, gi = _dft_matrices(N, modes)
    fcat = jnp.zeros((n_pad, 2 * modes), f32)
    fcat = fcat.at[:N, :modes].set(fr).at[:N, modes:].set(fi)          # (n_pad, 2m)
    gcat = jnp.zeros((2 * modes, n_pad), f32)
    gcat = gcat.at[:modes, :N].set(gr).at[modes:, :N].set(gi)          # (2m, n_pad)

    # conv1 + conv2 fused (both 1x1, single input channel): h2 = w21*x + b21
    w1v = w1.reshape(width).astype(f32)
    w2m = w2[:, :, 0].astype(f32)
    w21 = w2m @ w1v                                                    # (width,)
    b21 = w2m @ b1.astype(f32) + b2.astype(f32)                        # (width,)

    # rank-1 collapse: fold the affine channel map through the rfft into the
    # spectral weights.  out_ft[b,o,k] = S[b,k]*veff[o,k] + beff[o,k] with
    #   veff[o,k] = sum_c w21[c] * Wc[c,o,k]
    #   beff[o,k] = rfft(1)[k] * sum_c b21[c] * Wc[c,o,k]
    # and rfft(1)[k] (ortho) = sqrt(N) * delta_{k,0}  (analytic).
    wr32, wi32 = wr.astype(f32), wi.astype(f32)
    vr = jnp.einsum('c,cok->ok', w21, wr32)                            # (width, m)
    vi = jnp.einsum('c,cok->ok', w21, wi32)
    d0 = jnp.zeros((modes,), f32).at[0].set(np.sqrt(float(N)))
    br = d0[None, :] * jnp.einsum('c,cok->ok', b21, wr32)              # (width, m)
    bi = d0[None, :] * jnp.einsum('c,cok->ok', b21, wi32)

    # chunk-level (cb samples) constants -- all independent of bb (tiny).
    vcat = jnp.tile(jnp.concatenate([vr, vi], axis=1), (cb, 1))        # (cb*width, 2m)
    bcat = jnp.tile(jnp.concatenate([br, bi], axis=1), (cb, 1))        # (cb*width, 2m)
    rep = jnp.kron(jnp.eye(cb, dtype=f32), jnp.ones((width, 1), f32))  # (cb*width, cb)
    w5m = w5[:, :, 0].astype(f32)
    w5k = jnp.kron(jnp.eye(cb, dtype=f32), w5m)                        # (cb*out_ch, cb*width)
    b5c = jnp.tile(b5.reshape(out_ch, 1).astype(f32), (cb, 1))         # (cb*out_ch, 1)

    kernel = _make_kernel(modes, width, out_ch, bb, cb, n_pad)

    def cspec(shape):
        nd = len(shape)
        return pl.BlockSpec(shape, lambda bi, _n=nd: (0,) * _n)

    out_flat = pl.pallas_call(
        kernel,
        out_shape=jax.ShapeDtypeStruct((b_pad * out_ch, n_pad), f32),
        grid=grid,
        in_specs=[
            pl.BlockSpec((bb, n_pad), lambda bi: (bi, 0)),   # x batch block
            cspec((n_pad, 2 * modes)),                       # Fcat: truncated ortho rfft
            cspec((cb * width, 2 * modes)),                  # [vr | vi] effective spectral weights
            cspec((cb * width, 2 * modes)),                  # [br | bi] effective spectral bias
            cspec((cb * width, cb)),                         # chunk replication matrix
            cspec((2 * modes, n_pad)),                       # Gcat: truncated ortho irfft
            cspec((cb * out_ch, cb * width)),                # conv5 weight, kron(I_cb, W5)
            cspec((cb * out_ch, 1)),                         # conv5 bias
        ],
        out_specs=pl.BlockSpec((bb * out_ch, n_pad), lambda bi: (bi, 0)),
        compiler_params=pltpu.CompilerParams(
            dimension_semantics=("parallel",)),
    )(xp, fcat, vcat, bcat, rep, gcat, w5k, b5c)

    return out_flat.reshape(b_pad, out_ch, n_pad)[:B, :, :N]


def fno_reference(x, params):
    """Pure-JAX reference matching the PyTorch forward (uses jnp.fft)."""
    w1, b1, w2, b2, wr, wi, w5, b5 = params
    B, N = x.shape
    modes = wr.shape[2]
    hi = jax.lax.Precision.HIGHEST

    h = x[:, None, :]                                                        # (B, 1, N)
    h = jnp.einsum('oi,bin->bon', w1[:, :, 0], h, precision=hi) + b1[None, :, None]
    h = jnp.einsum('oi,bin->bon', w2[:, :, 0], h, precision=hi) + b2[None, :, None]
    x_ft = jnp.fft.rfft(h, axis=-1, norm='ortho')                            # (B, width, N//2+1)
    wc = (wr + 1j * wi).astype(jnp.complex64)                                # (in, out, modes)
    mix = jnp.einsum('bix,iox->box', x_ft[:, :, :modes], wc, precision=hi)
    out_ft = jnp.zeros((B, wr.shape[1], N // 2 + 1), dtype=jnp.complex64).at[:, :, :modes].set(mix)
    y = jnp.fft.irfft(out_ft, n=N, axis=-1, norm='ortho')                    # (B, width, N)
    y = jnp.maximum(y, 0.0)
    out = jnp.einsum('oi,bin->bon', w5[:, :, 0], y, precision=hi) + b5[None, :, None]
    return out


if __name__ == "__main__":
    B, N = 2, 16
    width, modes, out_ch = 32, 4, 4

    key = jax.random.PRNGKey(0)
    ks = jax.random.split(key, 9)
    x = jax.random.normal(ks[0], (B, N), dtype=jnp.float32)

    # deterministic synthetic parameters (PyTorch module shapes)
    w1 = jax.random.normal(ks[1], (width, 1, 1), dtype=jnp.float32)          # Conv1d(1, width, 1)
    b1 = jax.random.normal(ks[2], (width,), dtype=jnp.float32)
    w2 = jax.random.normal(ks[3], (width, width, 1), dtype=jnp.float32)      # Conv1d(width, width, 1)
    b2 = jax.random.normal(ks[4], (width,), dtype=jnp.float32)
    scale = 1.0 / (width * width)                                            # FourierLayer scale
    wr = scale * jax.random.normal(ks[5], (width, width, modes), dtype=jnp.float32)
    wi = scale * jax.random.normal(ks[6], (width, width, modes), dtype=jnp.float32)
    w5 = jax.random.normal(ks[7], (out_ch, width, 1), dtype=jnp.float32)     # Conv1d(width, out_ch, 1)
    b5 = jax.random.normal(ks[8], (out_ch,), dtype=jnp.float32)
    params = (w1, b1, w2, b2, wr, wi, w5, b5)

    out = jax.block_until_ready(fno_forward(x, params))
    ref = jax.block_until_ready(fno_reference(x, params))
    np.testing.assert_allclose(np.asarray(out), np.asarray(ref), rtol=5e-3, atol=5e-3)

    print("KERNEL_OK")
</pallas_src>

<mosaic_0001>
module attributes {stable_mosaic.version = 11 : i64} {
  func.func @kernel(%arg0: i32, %arg1: memref<8x128xf32, #tpu.memory_space<vmem>>, %arg2: memref<128x8xf32, #tpu.memory_space<vmem>>, %arg3: memref<256x8xf32, #tpu.memory_space<vmem>>, %arg4: memref<256x8xf32, #tpu.memory_space<vmem>>, %arg5: memref<256x8xf32, #tpu.memory_space<vmem>>, %arg6: memref<8x128xf32, #tpu.memory_space<vmem>>, %arg7: memref<32x256xf32, #tpu.memory_space<vmem>>, %arg8: memref<32x1xf32, #tpu.memory_space<vmem>>, %arg9: memref<32x128xf32, #tpu.memory_space<vmem>>) attributes {dimension_semantics = [#tpu.dimension_semantics<parallel>], iteration_bounds = array<i64: 1>, scalar_prefetch = 0 : i64, scratch_operands = 0 : i64, tpu.core_type = #tpu.core_type<tc>, window_params = [{transform_indices = @transform_0, window_bounds = array<i64: 8, 128>}, {pipeline_mode = #tpu.pipeline_mode<synchronous>, transform_indices = @transform_1, window_bounds = array<i64: 128, 8>}, {pipeline_mode = #tpu.pipeline_mode<synchronous>, transform_indices = @transform_2, window_bounds = array<i64: 256, 8>}, {pipeline_mode = #tpu.pipeline_mode<synchronous>, transform_indices = @transform_3, window_bounds = array<i64: 256, 8>}, {pipeline_mode = #tpu.pipeline_mode<synchronous>, transform_indices = @transform_4, window_bounds = array<i64: 256, 8>}, {pipeline_mode = #tpu.pipeline_mode<synchronous>, transform_indices = @transform_5, window_bounds = array<i64: 8, 128>}, {pipeline_mode = #tpu.pipeline_mode<synchronous>, transform_indices = @transform_6, window_bounds = array<i64: 32, 256>}, {pipeline_mode = #tpu.pipeline_mode<synchronous>, transform_indices = @transform_7, window_bounds = array<i64: 32, 1>}, {transform_indices = @transform_8, window_bounds = array<i64: 32, 128>}]} {
    %c0 = arith.constant 0 : index
    %c0_0 = arith.constant 0 : index
    %0 = vector.load %arg1[%c0, %c0_0] : memref<8x128xf32, #tpu.memory_space<vmem>>, vector<8x128xf32>
    %c0_1 = arith.constant 0 : index
    %c0_2 = arith.constant 0 : index
    %1 = vector.load %arg2[%c0_1, %c0_2] : memref<128x8xf32, #tpu.memory_space<vmem>>, vector<128x8xf32>
    %cst = arith.constant dense<0.000000e+00> : vector<8x8xf32>
    %2 = tpu.matmul %0, %1, %cst {dimension_numbers = #tpu.dot_dimension_numbers<[1], [0], [0], [1], [0, 0, 1, 1], [], []>} : vector<8x128xf32>, vector<128x8xf32>, vector<8x8xf32> -> vector<8x8xf32>
    %c0_3 = arith.constant 0 : index
    %c0_4 = arith.constant 0 : index
    %3 = vector.load %arg3[%c0_3, %c0_4] : memref<256x8xf32, #tpu.memory_space<vmem>>, vector<256x8xf32>
    %c0_5 = arith.constant 0 : index
    %c0_6 = arith.constant 0 : index
    %4 = vector.load %arg4[%c0_5, %c0_6] : memref<256x8xf32, #tpu.memory_space<vmem>>, vector<256x8xf32>
    %5 = vector.extract_strided_slice %3 {offsets = [0, 0], sizes = [256, 4], strides = [1, 1]} : vector<256x8xf32> to vector<256x4xf32>
    %6 = vector.extract_strided_slice %3 {offsets = [0, 4], sizes = [256, 4], strides = [1, 1]} : vector<256x8xf32> to vector<256x4xf32>
    %c0_7 = arith.constant 0 : index
    %c0_8 = arith.constant 0 : index
    %7 = vector.load %arg5[%c0_7, %c0_8] : memref<256x8xf32, #tpu.memory_space<vmem>>, vector<256x8xf32>
    %c0_9 = arith.constant 0 : index
    %c0_10 = arith.constant 0 : index
    %8 = vector.load %arg6[%c0_9, %c0_10] : memref<8x128xf32, #tpu.memory_space<vmem>>, vector<8x128xf32>
    %c0_11 = arith.constant 0 : index
    %c0_12 = arith.constant 0 : index
    %9 = vector.load %arg7[%c0_11, %c0_12] : memref<32x256xf32, #tpu.memory_space<vmem>>, vector<32x256xf32>
    %c0_13 = arith.constant 0 : index
    %c0_14 = arith.constant 0 : index
    %10 = vector.load %arg8[%c0_13, %c0_14] : memref<32x1xf32, #tpu.memory_space<vmem>>, vector<32x1xf32>
    %cst_15 = arith.constant dense<0.000000e+00> : vector<256x8xf32>
    %11 = tpu.matmul %7, %2, %cst_15 {dimension_numbers = #tpu.dot_dimension_numbers<[1], [0], [0], [1], [0, 0, 1, 1], [], []>} : vector<256x8xf32>, vector<8x8xf32>, vector<256x8xf32> -> vector<256x8xf32>
    %12 = vector.extract_strided_slice %11 {offsets = [0, 0], sizes = [256, 4], strides = [1, 1]} : vector<256x8xf32> to vector<256x4xf32>
    %13 = vector.extract_strided_slice %11 {offsets = [0, 4], sizes = [256, 4], strides = [1, 1]} : vector<256x8xf32> to vector<256x4xf32>
    %14 = arith.mulf %12, %5 : vector<256x4xf32>
    %15 = arith.mulf %13, %6 : vector<256x4xf32>
    %16 = arith.subf %14, %15 : vector<256x4xf32>
    %17 = arith.mulf %12, %6 : vector<256x4xf32>
    %18 = arith.mulf %13, %5 : vector<256x4xf32>
    %19 = arith.addf %17, %18 : vector<256x4xf32>
    %20 = tpu.concatenate %16, %19 in 1 : vector<256x4xf32>, vector<256x4xf32> -> vector<256x8xf32>
    %21 = arith.addf %20, %4 : vector<256x8xf32>
    %cst_16 = arith.constant dense<0.000000e+00> : vector<256x128xf32>
    %22 = tpu.matmul %21, %8, %cst_16 {dimension_numbers = #tpu.dot_dimension_numbers<[1], [0], [0], [1], [0, 0, 1, 1], [], []>} : vector<256x8xf32>, vector<8x128xf32>, vector<256x128xf32> -> vector<256x128xf32>
    %cst_17 = arith.constant 0.000000e+00 : f32
    %23 = vector.broadcast %cst_17 : f32 to vector<256x128xf32>
    %24 = arith.maximumf %22, %23 : vector<256x128xf32>
    %cst_18 = arith.constant dense<0.000000e+00> : vector<32x128xf32>
    %25 = tpu.matmul %9, %24, %cst_18 {dimension_numbers = #tpu.dot_dimension_numbers<[1], [0], [0], [1], [0, 0, 1, 1], [], []>} : vector<32x256xf32>, vector<256x128xf32>, vector<32x128xf32> -> vector<32x128xf32>
    %26 = vector.broadcast %10 : vector<32x1xf32> to vector<32x128xf32>
    %27 = arith.addf %25, %26 : vector<32x128xf32>
    %c0_19 = arith.constant 0 : index
    %c0_20 = arith.constant 0 : index
    %28 = vector.load %arg9[%c0_19, %c0_20] : memref<32x128xf32, #tpu.memory_space<vmem>>, vector<32x128xf32>
    tpu.vector_store %arg9[%c0_19, %c0_20], %27 {strides = array<i32>} : memref<32x128xf32, #tpu.memory_space<vmem>>, vector<32x128xf32>,
    return
  }
  func.func @transform_0(%arg0: i32) -> (i32, i32) {
    %c0_i32 = arith.constant 0 : i32
    %c0_i32_0 = arith.constant 0 : i32
    return %arg0, %c0_i32 : i32, i32
  }
  func.func @transform_1(%arg0: i32) -> (i32, i32) {
    %c0_i32 = arith.constant 0 : i32
    %c0_i32_0 = arith.constant 0 : i32
    %c0_i32_1 = arith.constant 0 : i32
    return %c0_i32, %c0_i32_0 : i32, i32
  }
  func.func @transform_2(%arg0: i32) -> (i32, i32) {
    %c0_i32 = arith.constant 0 : i32
    %c0_i32_0 = arith.constant 0 : i32
    %c0_i32_1 = arith.constant 0 : i32
    return %c0_i32, %c0_i32_0 : i32, i32
  }
  func.func @transform_3(%arg0: i32) -> (i32, i32) {
    %c0_i32 = arith.constant 0 : i32
    %c0_i32_0 = arith.constant 0 : i32
    %c0_i32_1 = arith.constant 0 : i32
    return %c0_i32, %c0_i32_0 : i32, i32
  }
  func.func @transform_4(%arg0: i32) -> (i32, i32) {
    %c0_i32 = arith.constant 0 : i32
    %c0_i32_0 = arith.constant 0 : i32
    %c0_i32_1 = arith.constant 0 : i32
    return %c0_i32, %c0_i32_0 : i32, i32
  }
  func.func @transform_5(%arg0: i32) -> (i32, i32) {
    %c0_i32 = arith.constant 0 : i32
    %c0_i32_0 = arith.constant 0 : i32
    %c0_i32_1 = arith.constant 0 : i32
    return %c0_i32, %c0_i32_0 : i32, i32
  }
  func.func @transform_6(%arg0: i32) -> (i32, i32) {
    %c0_i32 = arith.constant 0 : i32
    %c0_i32_0 = arith.constant 0 : i32
    %c0_i32_1 = arith.constant 0 : i32
    return %c0_i32, %c0_i32_0 : i32, i32
  }
  func.func @transform_7(%arg0: i32) -> (i32, i32) {
    %c0_i32 = arith.constant 0 : i32
    %c0_i32_0 = arith.constant 0 : i32
    %c0_i32_1 = arith.constant 0 : i32
    return %c0_i32, %c0_i32_0 : i32, i32
  }
  func.func @transform_8(%arg0: i32) -> (i32, i32) {
    %c0_i32 = arith.constant 0 : i32
    %c0_i32_0 = arith.constant 0 : i32
    return %arg0, %c0_i32 : i32, i32
  }
}

</mosaic_0001>

<bundles_post_ra>
// kernel: tpu_custom_call.1
= control target key start
LH: loop header
LB: loop body
LE: loop exit
PB: predicated region body
PF: predicated region fallthrough
CT: control target
= control target key end

     0   :  { %s1677_s17 = smov 4   ;;  %s3079_s0 = inlined_call_operand.vmem [shape: f32[8,128], index: 0, kind: input, shape index: {}]   ;;  %s3080_s1 = inlined_call_operand.vmem [shape: f32[128,8], index: 1, kind: input, shape index: {}]   ;;  %s3081_s2 = inlined_call_operand.vmem [shape: f32[256,8], index: 2, kind: input, shape index: {}]   ;;  %s3082_s3 = inlined_call_operand.vmem [shape: f32[256,8], index: 3, kind: input, shape index: {}]   ;;  %s3083_s4 = inlined_call_operand.vmem [shape: f32[256,8], index: 4, kind: input, shape index: {}]   ;;  %s3084_s5 = inlined_call_operand.vmem [shape: f32[8,128], index: 5, kind: input, shape index: {}]   ;;  %s3085_s6 = inlined_call_operand.vmem [shape: f32[32,256], index: 6, kind: input, shape index: {}]   ;;  %s3086_s7 = inlined_call_operand.vmem [shape: f32[32,1], index: 7, kind: input, shape index: {}]   ;;  %s3087_s8 = inlined_call_operand.hbm [shape: f32[32,128], index: 8, kind: output, shape index: {}]  }
   0x1   :  { %v46_v0 = vld [vmem:[%s3080_s1 + $0x78] sm:$0xff]  ;;  %v45_v1 = vld [vmem:[%s3080_s1 + $0x70] sm:$0xff]  ;;  %v44_v2 = vld [vmem:[%s3080_s1 + $0x68] sm:$0xff] }
   0x2   :  { %47 = vmatpush.msra.mxu0 %v46_v0  ;;  %v43_v3 = vld [vmem:[%s3080_s1 + $0x60] sm:$0xff]  ;;  %v42_v5 = vld [vmem:[%s3080_s1 + $0x58] sm:$0xff]  ;;  %v1753_v6 = vld [vmem:[%s3081_s2 + $0x70] sm:$0xff] }
   0x3   :  { %v1743_v4 = vld [vmem:[%s3081_s2 + $0x60] sm:$0xff]  ;;  %766 = vrot.lane.b32.xlu1 %v1753_v6, %s1677_s17  ;;  %v41_v8 = vld [vmem:[%s3080_s1 + $0x50] sm:$0xff] }
   0x4   :  { %48 = vmatpush.msra.mxu0 %v45_v1  ;;  %762 = vrot.lane.b32.xlu0 %v1743_v4, %s1677_s17  ;;  %v1760_v7 = vld [vmem:[%s3081_s2 + $0x80] sm:$0xff] }
   0x5   :  { %770 = vrot.lane.b32.xlu2 %v1760_v7, %s1677_s17 }
   0x6   :  { %49 = vmatpush.msra.mxu0 %v44_v2 }
   0x8   :  { %50 = vmatpush.msra.mxu0 %v43_v3 }
   0x9   :  { %13 = vsyncpa [#allocation3], 0  ;;  %v40_v9 = vld [vmem:[%s3080_s1 + $0x48] sm:$0xff]  ;;  %v39_v11 = vld [vmem:[%s3080_s1 + $0x40] sm:$0xff]  ;;  %s1678_s14 = smov 124   ;;  %vm176_vm0 = vcmask 64512  }
   0xa   :  { %51 = vmatpush.msra.mxu0 %v42_v5  ;;  %v1773_v10 = vld [vmem:[%s3081_s2 + $0x68] sm:$0xff]  ;;  %v1781_v12 = vld [vmem:[%s3081_s2 + $0x78] sm:$0xff]  ;;  %v37_v14 = vld [vmem:[%s3080_s1 + $0x30] sm:$0xff]  ;;  %vm1154_vm1 = vcmask 31744   ;;  %s1548_s24 = sshll.u32 %s3087_s8, 4  ;;  %s1681_s25 = smov 128   ;;  %s1549_s24 = int_to_ptr.hbm [resolvable:$true] %s1548_s24 }
   0xb   :  { %v38_v13 = vld [vmem:[%s3080_s1 + $0x38] sm:$0xff]  ;;  %768 = vrot.lane.b32.xlu1 %v1781_v12, %s1677_s17  ;;  %v36_v15 = vld [vmem:[%s3080_s1 + $0x28] sm:$0xff]  ;;  %v35_v17 = vld [vmem:[%s3080_s1 + $0x20] sm:$0xff] }
   0xc   :  { %52 = vmatpush.msra.mxu0 %v41_v8  ;;  %764 = vrot.lane.b32.xlu0 %v1773_v10, %s1677_s17  ;;  %v1801_v16 = vld [vmem:[%s3081_s2 + $0x88] sm:$0xff]  ;;  %v1809_v18 = vld [vmem:[%s3081_s2 + $0x90] sm:$0xff]  ;;  %v1814_v19 = vld [vmem:[%s3081_s2] sm:$0xff] }
   0xd   :  { %634 = vrot.lane.b32.xlu2 %v1743_v4, %s1678_s14  ;;  %v34_v20 = vld [vmem:[%s3080_s1 + $0x18] sm:$0xff]  ;;  %v33_v21 = vld [vmem:[%s3080_s1 + $0x10] sm:$0xff]  ;;  %v32_v22 = vld [vmem:[%s3080_s1 + $0x8] sm:$0xff] }
   0xe   :  { %53 = vmatpush.msra.mxu0 %v40_v9  ;;  %v31_v23 = vld [vmem:[%s3080_s1] sm:$0xff]  ;;  %v1840_v25 = vld [vmem:[%s3081_s2 + $0x98] sm:$0xff]  ;;  %v1851_v26 = vld [vmem:[%s3081_s2 + $0x8] sm:$0xff] }
   0xf   :  { %v30_v24 = vld [vmem:[%s3079_s0] sm:$0xff]  ;;  %v1856_v27 = vld [vmem:[%s3081_s2 + $0x10] sm:$0xff]  ;;  %v1872_v29 = vld [vmem:[%s3081_s2 + $0xa8] sm:$0xff] }
  0x10   :  { %54 = vmatpush.msra.mxu0 %v39_v11  ;;  %v1867_v28 = vld [vmem:[%s3081_s2 + $0xa0] sm:$0xff]  ;;  %v1892_v31 = vld [vmem:[%s3081_s2 + $0xb0] sm:$0xff]  ;;  %v1901_v32 = vld [vmem:[%s3081_s2 + $0x18] sm:$0xff] }
  0x11   :  { %v1885_v30 = vld [vmem:[%s3081_s2 + $0x20] sm:$0xff]  ;;  %v1908_v33 = vld [vmem:[%s3081_s2 + $0x28] sm:$0xff]  ;;  %v1917_v34 = vld [vmem:[%s3081_s2 + $0x30] sm:$0xff] }
  0x12   :  { %55 = vmatpush.msra.mxu0 %v38_v13  ;;  %3120 = vst [vmem:[#allocation5_spill] sm:$0xff] %v1908_v33  ;;  %v1926_v35 = vld [vmem:[%s3081_s2 + $0xb8] sm:$0xff]  ;;  %v1933_v36 = vld [vmem:[%s3081_s2 + $0xc0] sm:$0xff]  ;;  %v1964_v42 = vld [vmem:[%s3081_s2 + $0xc8] sm:$0xff] }
  0x13   :  { %774 = vrot.lane.b32.xlu1 %v1809_v18, %s1677_s17  ;;  %3121 = vst [vmem:[#allocation6_spill] sm:$0xff] %v1917_v34  ;;  %v131_v37 = vld [vmem:[%s3083_s4] sm:$0xff]  ;;  %v1952_v40 = vld [vmem:[%s3081_s2 + $0x38] sm:$0xff]  ;;  %v132_v43 = vld [vmem:[%s3083_s4 + $0x8] sm:$0xff] }
  0x14   :  { %56 = vmatpush.msra.mxu0 %v37_v14  ;;  %772 = vrot.lane.b32.xlu0 %v1801_v16, %s1677_s17  ;;  %3122 = vst [vmem:[#allocation7_spill] sm:$0xff] %v1926_v35  ;;  %v151_v38 = vld [vmem:[%s3083_s4 + $0xa0] sm:$0xff]  ;;  %v152_v44 = vld [vmem:[%s3083_s4 + $0xa8] sm:$0xff]  ;;  %v133_v45 = vld [vmem:[%s3083_s4 + $0x10] sm:$0xff] }
  0x15   :  { %738 = vrot.lane.b32.xlu2 %v1814_v19, %s1677_s17  ;;  %3123 = vst [vmem:[#allocation8_spill] sm:$0xff] %v1933_v36  ;;  %v1959_v41 = vld [vmem:[%s3081_s2 + $0x40] sm:$0xff]  ;;  %v153_v46 = vld [vmem:[%s3083_s4 + $0xb0] sm:$0xff]  ;;  %v2004_v49 = vld [vmem:[%s3081_s2 + $0xd8] sm:$0xff] }
  0x16   :  { %57 = vmatpush.msra.mxu0 %v36_v15  ;;  %3124 = vst [vmem:[#allocation9_spill] sm:$0xff] %v1952_v40  ;;  %v1995_v47 = vld [vmem:[%s3081_s2 + $0xd0] sm:$0xff]  ;;  %v134_v51 = vld [vmem:[%s3083_s4 + $0x18] sm:$0xff]  ;;  %v2025_v54 = vld [vmem:[%s3081_s2 + $0x48] sm:$0xff] }
  0x17   :  { %3125 = vst [vmem:[#allocation10_spill] sm:$0xff] %v1959_v41  ;;  %v154_v52 = vld [vmem:[%s3083_s4 + $0xb8] sm:$0xff]  ;;  %v135_v57 = vld [vmem:[%s3083_s4 + $0x20] sm:$0xff]  ;;  %v2050_v60 = vld [vmem:[%s3081_s2 + $0x50] sm:$0xff] }
  0x18   :  { %58 = vmatpush.msra.mxu0 %v35_v17  ;;  %3126 = vst [vmem:[#allocation11_spill] sm:$0xff] %v1964_v42  ;;  %v155_v58 = vld [vmem:[%s3083_s4 + $0xc0] sm:$0xff]  ;;  %v136_v62 = vld [vmem:[%s3083_s4 + $0x28] sm:$0xff]  ;;  %v137_v3 = vld [vmem:[%s3083_s4 + $0x30] sm:$0xff] }
  0x19   :  { %3127 = vst [vmem:[#allocation12_spill] sm:$0xff] %v1995_v47  ;;  %v156_v63 = vld [vmem:[%s3083_s4 + $0xc8] sm:$0xff]  ;;  %v157_v5 = vld [vmem:[%s3083_s4 + $0xd0] sm:$0xff]  ;;  %v138_v13 = vld [vmem:[%s3083_s4 + $0x38] sm:$0xff] }
  0x1a   :  { %59 = vmatpush.msra.mxu0 %v34_v20  ;;  %3128 = vst [vmem:[#allocation13_spill] sm:$0xff] %v2004_v49  ;;  %v2087_v8 = vld [vmem:[%s3081_s2 + $0xe8] sm:$0xff]  ;;  %v158_v14 = vld [vmem:[%s3083_s4 + $0xd8] sm:$0xff] }
  0x1b   :  { %638 = vrot.lane.b32.xlu1 %v1753_v6, %s1678_s14  ;;  %3129 = vst [vmem:[#allocation14_spill] sm:$0xff] %v2025_v54 }
  0x1c   :  { %60 = vmatpush.msra.mxu0 %v33_v21  ;;  %636 = vrot.lane.b32.xlu0 %v1773_v10, %s1678_s14  ;;  %3130 = vst [vmem:[#allocation15_spill] sm:$0xff] %v2087_v8  ;;  %v139_v21 = vld [vmem:[%s3083_s4 + $0x40] sm:$0xff] }
  0x1d   :  { %776 = vrot.lane.b32.xlu2 %v1840_v25, %s1677_s17 }
  0x1e   :  { %61 = vmatpush.msra.mxu0 %v32_v22  ;;  %v159_v22 = vld [vmem:[%s3083_s4 + $0xe0] sm:$0xff] }
  0x20   :  { %62 = vmatpush.msra.mxu0 %v31_v23  ;;  %v2126_v23 = vld [vmem:[%s3081_s2 + $0xf0] sm:$0xff] }
  0x21   :  { %63 = vmatmul.f32.vlgmr.msra.gmra.mxu0 %v30_v24  ;;  %3131 = vst [vmem:[#allocation16_spill] sm:$0xff] %v2126_v23 }
  0x23   :  { %742 = vrot.lane.b32.xlu1 %v1856_v27, %s1677_s17 }
  0x24   :  { %740 = vrot.lane.b32.xlu0 %v1851_v26, %s1677_s17 }
  0x25   :  { %640 = vrot.lane.b32.xlu2 %v1781_v12, %s1678_s14 }
  0x2b   :  { %780 = vrot.lane.b32.xlu1 %v1872_v29, %s1677_s17 }
  0x2c   :  { %778 = vrot.lane.b32.xlu0 %v1867_v28, %s1677_s17 }
  0x2d   :  { %744 = vrot.lane.b32.xlu2 %v1901_v32, %s1677_s17 }
  0x33   :  { %644 = vrot.lane.b32.xlu1 %v1801_v16, %s1678_s14 }
  0x34   :  { %642 = vrot.lane.b32.xlu0 %v1760_v7, %s1678_s14 }
  0x35   :  { %646 = vrot.lane.b32.xlu2 %v1809_v18, %s1678_s14 }
  0x3b   :  { %748 = vrot.lane.b32.xlu1 %v1908_v33, %s1677_s17 }
  0x3c   :  { %746 = vrot.lane.b32.xlu0 %v1885_v30, %s1677_s17 }
  0x3d   :  { %784 = vrot.lane.b32.xlu2 %v1926_v35, %s1677_s17 }
  0x43   :  { %648 = vrot.lane.b32.xlu1 %v1840_v25, %s1678_s14 }
  0x44   :  { %782 = vrot.lane.b32.xlu0 %v1892_v31, %s1677_s17 }
  0x45   :  { %612 = vrot.lane.b32.xlu2 %v1851_v26, %s1678_s14 }
  0x4b   :  { %786 = vrot.lane.b32.xlu1 %v1933_v36, %s1677_s17 }
  0x4c   :  { %610 = vrot.lane.b32.xlu0 %v1814_v19, %s1678_s14 }
  0x4d   :  { %752 = vrot.lane.b32.xlu2 %v1952_v40, %s1677_s17 }
  0x53   :  { %614 = vrot.lane.b32.xlu1 %v1856_v27, %s1678_s14 }
  0x54   :  { %750 = vrot.lane.b32.xlu0 %v1917_v34, %s1677_s17 }
  0x55   :  { %652 = vrot.lane.b32.xlu2 %v1872_v29, %s1678_s14 }
  0x5b   :  { %754 = vrot.lane.b32.xlu1 %v1959_v41, %s1677_s17 }
  0x5c   :  { %650 = vrot.lane.b32.xlu0 %v1867_v28, %s1678_s14 }
  0x5d   :  { %790 = vrot.lane.b32.xlu2 %v1995_v47, %s1677_s17 }
  0x5f   :  { %v1999_v48 = vpop.permute.xlu2 %770 }
  0x63   :  { %654 = vrot.lane.b32.xlu1 %v1892_v31, %s1678_s14 }
  0x64   :  { %788 = vrot.lane.b32.xlu0 %v1964_v42, %s1677_s17 }
  0x65   :  { %618 = vrot.lane.b32.xlu2 %v1885_v30, %s1678_s14 }
  0x67   :  { %v2020_v53 = vpop.permute.xlu2 %634 }
  0x6b   :  { %792 = vrot.lane.b32.xlu1 %v2004_v49, %s1677_s17 }
  0x6c   :  { %616 = vrot.lane.b32.xlu0 %v1901_v32, %s1678_s14 }
  0x6d   :  { %622 = vrot.lane.b32.xlu2 %v1917_v34, %s1678_s14 }
  0x6f   :  { %v2045_v59 = vpop.permute.xlu2 %738 }
  0x73   :  { %620 = vrot.lane.b32.xlu1 %v1908_v33, %s1678_s14 }
  0x74   :  { %756 = vrot.lane.b32.xlu0 %v2025_v54, %s1677_s17 }
  0x75   :  { %v2031_v55 = vpop.permute.xlu1 %766  ;;  %658 = vrot.lane.b32.xlu2 %v1933_v36, %s1678_s14 }
  0x76   :  { %v2010_v50 = vpop.permute.xlu0 %762 }
  0x77   :  { %v2070_v1 = vpop.permute.xlu2 %776 }
  0x7b   :  { %656 = vrot.lane.b32.xlu1 %v1926_v35, %s1678_s14 }
  0x7c   :  { %758 = vrot.lane.b32.xlu0 %v2050_v60, %s1677_s17 }
  0x7d   :  { %v2054_v61 = vpop.permute.xlu1 %768  ;;  %796 = vrot.lane.b32.xlu2 %v2087_v8, %s1677_s17 }
  0x7e   :  { %v2035_v56 = vpop.permute.xlu0 %764 }
  0x7f   :  { %v2093_v11 = vpop.permute.xlu2 %640 }
  0x84   :  { %624 = vrot.lane.b32.xlu0 %v1952_v40, %s1678_s14 }
  0x85   :  { %v2076_v2 = vpop.permute.xlu1 %774  ;;  %660 = vrot.lane.b32.xlu2 %v1964_v42, %s1678_s14 }
  0x86   :  { %v2066_v0 = vpop.permute.xlu0 %772 }
  0x87   :  { %v2113_v20 = vpop.permute.xlu2 %744 }
  0x8c   :  { %626 = vrot.lane.b32.xlu0 %v1959_v41, %s1678_s14 }
  0x8d   :  { %v2105_v15 = vpop.permute.xlu1 %638  ;;  %798 = vrot.lane.b32.xlu2 %v2126_v23, %s1677_s17  ;;  %v146_v23 = vld [vmem:[%s3083_s4 + $0x78] sm:$0xff] }
  0x8e   :  { %v2091_v9 = vpop.permute.xlu0 %636 }
  0x94   :  { %628 = vrot.lane.b32.xlu0 %v2025_v54, %s1678_s14 }
  0x95   :  { %v2128_v24 = vpop.permute.xlu1 %742  ;;  %662 = vrot.lane.b32.xlu2 %v1995_v47, %s1678_s14 }
  0x96   :  { %v2111_v17 = vpop.permute.xlu0 %740 }
  0x9e   :  { %v64_v39 = vpop.f32.mrf.mxu0 }
  0x9f   :  { %288 = vmatpush.msra.mxu1 %v64_v39  ;;  %1624 = vmatpush.msra.mxu3 %v64_v39  ;;  %v779_v39 = vpop.permute.xlu0 %778 }
  0xa0   :  { %1560 = vmatmul.msk.f32.vlgmr.msra.gmra.mxu1 %vm176_vm0, %v131_v37  ;;  %1580 = vmatmul.msk.f32.vlgmr.msra.gmra.mxu3 %vm176_vm0, %v151_v38  ;;  %v2135_v37 = vld [vmem:[%s3081_s2 + $0xe0] sm:$0xff]  ;;  %v2141_v38 = vpop.permute.xlu2 %646 }
  0xa1   :  { %794 = vrot.lane.b32.xlu1 %v2135_v37, %s1677_s17  ;;  %3132 = vst [vmem:[#allocation17_spill] sm:$0xff] %v2141_v38 }
  0xa8   :  { %1561 = vmatmul.msk.f32.gmra.mxu1 %vm176_vm0, %v132_v43  ;;  %1581 = vmatmul.msk.f32.gmra.mxu3 %vm176_vm0, %v152_v44  ;;  %v140_v43 = vld [vmem:[%s3083_s4 + $0x48] sm:$0xff] }
  0xa9   :  { %v160_v44 = vld [vmem:[%s3083_s4 + $0xe8] sm:$0xff] }
  0xb0   :  { %1562 = vmatmul.msk.f32.gmra.mxu1 %vm176_vm0, %v133_v45  ;;  %1582 = vmatmul.msk.f32.gmra.mxu3 %vm176_vm0, %v153_v46  ;;  %v2154_v45 = vld [vmem:[%s3081_s2 + $0x58] sm:$0xff]  ;;  %v2156_v46 = vpop.permute.xlu1 %780 }
  0xb1   :  { %3133 = vst [vmem:[#allocation18_spill] sm:$0xff] %v2154_v45  ;;  %760 = vrot.lane.b32.xlu1 %v2154_v45, %s1677_s17 }
  0xb8   :  { %1563 = vmatmul.msk.f32.gmra.mxu1 %vm176_vm0, %v134_v51  ;;  %1583 = vmatmul.msk.f32.gmra.mxu3 %vm176_vm0, %v154_v52  ;;  %v2162_v51 = vpop.permute.xlu2 %784  ;;  %v141_v52 = vld [vmem:[%s3083_s4 + $0x50] sm:$0xff] }
  0xc0   :  { %1564 = vmatmul.msk.f32.gmra.mxu1 %vm176_vm0, %v135_v57  ;;  %1584 = vmatmul.msk.f32.gmra.mxu3 %vm176_vm0, %v155_v58  ;;  %v161_v57 = vld [vmem:[%s3083_s4 + $0xf0] sm:$0xff]  ;;  %v2170_v58 = vpop.permute.xlu0 %642 }
  0xc8   :  { %1565 = vmatmul.msk.f32.gmra.mxu1 %vm176_vm0, %v136_v62  ;;  %1585 = vmatmul.msk.f32.gmra.mxu3 %vm176_vm0, %v156_v63  ;;  %v2175_v62 = vld [vmem:[%s3081_s2 + $0xf8] sm:$0xff]  ;;  %v613_v63 = vpop.permute.xlu2 %612 }
  0xc9   :  { %3134 = vst [vmem:[#allocation19_spill] sm:$0xff] %v2175_v62  ;;  %800 = vrot.lane.b32.xlu2 %v2175_v62, %s1677_s17  ;;  %v145_v62 = vld [vmem:[%s3083_s4 + $0x70] sm:$0xff] }
  0xd0   :  { %1566 = vmatmul.msk.f32.gmra.mxu1 %vm176_vm0, %v137_v3  ;;  %1586 = vmatmul.msk.f32.gmra.mxu3 %vm176_vm0, %v157_v5  ;;  %v2181_v3 = vpop.permute.xlu1 %644  ;;  %v142_v5 = vld [vmem:[%s3083_s4 + $0x58] sm:$0xff] }
  0xd1   :  { %3135 = vst [vmem:[#allocation20_spill] sm:$0xff] %v2181_v3  ;;  %664 = vrot.lane.b32.xlu2 %v2004_v49, %s1678_s14 }
  0xd8   :  { %1567 = vmatmul.msk.f32.gmra.mxu1 %vm176_vm0, %v138_v13  ;;  %1587 = vmatmul.msk.f32.gmra.mxu3 %vm176_vm0, %v158_v14  ;;  %v162_v13 = vld [vmem:[%s3083_s4 + $0xf8] sm:$0xff]  ;;  %v2190_v14 = vpop.permute.xlu0 %746 }
  0xe0   :  { %1568 = vmatmul.msk.f32.gmra.mxu1 %vm176_vm0, %v139_v21  ;;  %1588 = vmatmul.msk.f32.gmra.mxu3 %vm176_vm0, %v159_v22  ;;  %v2195_v21 = vpop.permute.xlu2 %752  ;;  %v143_v22 = vld [vmem:[%s3083_s4 + $0x60] sm:$0xff] }
  0xe8   :  { %1569 = vmatmul.msk.f32.gmra.mxu1 %vm176_vm0, %v140_v43  ;;  %1589 = vmatmul.msk.f32.gmra.mxu3 %vm176_vm0, %v160_v44  ;;  %v2200_v43 = vpop.permute.xlu1 %748  ;;  %v783_v44 = vpop.permute.xlu0 %782 }
  0xf0   :  { %1570 = vmatmul.msk.f32.gmra.mxu1 %vm176_vm0, %v141_v52  ;;  %1590 = vmatmul.msk.f32.gmra.mxu3 %vm176_vm0, %v161_v57  ;;  %v653_v52 = vpop.permute.xlu2 %652  ;;  %v144_v57 = vld [vmem:[%s3083_s4 + $0x68] sm:$0xff]  ;;  %v611_v49 = vpop.permute.xlu0 %610 }
  0xf8   :  { %1571 = vmatmul.msk.f32.gmra.mxu1 %vm176_vm0, %v142_v5  ;;  %1591 = vmatmul.msk.f32.gmra.mxu3 %vm176_vm0, %v162_v13  ;;  %v2206_v5 = vpop.permute.xlu1 %648  ;;  %v2209_v13 = vpop.permute.xlu2 %790 }
  0xf9   :  { %3136 = vst [vmem:[#allocation21_spill] sm:$0xff] %v2206_v5  ;;  %v2222_v41 = vpop.permute.xlu0 %750 }
 0x100   :  { %1572 = vmatmul.msk.f32.gmra.mxu1 %vm176_vm0, %v143_v22  ;;  %v2215_v22 = vpop.permute.xlu1 %786  ;;  %v2217_v54 = vpop.permute.xlu2 %618 }
 0x108   :  { %1573 = vmatmul.msk.f32.gmra.mxu1 %vm176_vm0, %v144_v57  ;;  %v615_v57 = vpop.permute.xlu1 %614  ;;  %v2225_v47 = vpop.permute.xlu2 %622 }
 0x110   :  { %1574 = vmatmul.msk.f32.gmra.mxu1 %vm176_vm0, %v145_v62  ;;  %v147_v62 = vld [vmem:[%s3083_s4 + $0x80] sm:$0xff]  ;;  %v2240_v36 = vpop.permute.xlu2 %658 }
 0x118   :  { %1575 = vmatmul.msk.f32.gmra.mxu1 %vm176_vm0, %v146_v23  ;;  %v651_v23 = vpop.permute.xlu0 %650  ;;  %v2262_v35 = vpop.permute.xlu2 %796 }
 0x119   :  { %3138 = vst [vmem:[#allocation23_spill] sm:$0xff] %v2262_v35 }
 0x11d   :  { %v290_v45 = vpop.f32.mrf.mxu1 }
 0x11e   :  { %v2231_v40 = vmul.f32 %v290_v45, %v1814_v19  ;;  %v834_v42 = vmul.f32 %v2045_v59, %v290_v45  ;;  %v2234_v38 = vmul.f32 %v611_v49, %v290_v45  ;;  %v148_v49 = vld [vmem:[%s3083_s4 + $0x88] sm:$0xff]  ;;  %v2247_v59 = vpop.permute.xlu1 %754 }
 0x120   :  { %1576 = vmatmul.msk.f32.gmra.mxu1 %vm176_vm0, %v147_v62  ;;  %898 = vrot.lane.b32.xlu0 %v834_v42, %s1678_s14 }
 0x121   :  { %450 = vrot.lane.b32.xlu2 %v2231_v40, %s1678_s14 }
 0x123   :  { %v350_v8 = vpop.f32.mrf.mxu3 }
 0x124   :  { %v854_v5 = vmul.f32 %v779_v39, %v350_v8  ;;  %v2242_v34 = vmul.f32 %v651_v23, %v350_v8  ;;  %v2259_v39 = vpop.permute.xlu0 %788 }
 0x125   :  { %v293_v19 = vpop.f32.mrf.mxu1 }
 0x126   :  { %v2250_v45 = vmul.f32 %v293_v19, %v1851_v26  ;;  %v835_v42 = vmul.f32 %v2111_v17, %v293_v19  ;;  %938 = vrot.lane.b32.xlu1 %v854_v5, %s1678_s14  ;;  %v2254_v62 = vmul.f32 %v613_v63, %v293_v19  ;;  %v2265_v26 = vmul.f32 %v350_v8, %v1867_v28  ;;  %v149_v19 = vld [vmem:[%s3083_s4 + $0x90] sm:$0xff] }
 0x128   :  { %3137 = vst [vmem:[#allocation22_spill] sm:$0xff] %v2250_v45  ;;  %1577 = vmatmul.msk.f32.gmra.mxu1 %vm176_vm0, %v148_v49  ;;  %452 = vrot.lane.b32.xlu0 %v2250_v45, %s1678_s14 }
 0x129   :  { %900 = vrot.lane.b32.xlu2 %v835_v42, %s1678_s14  ;;  %v655_v42 = vpop.permute.xlu1 %654 }
 0x12b   :  { %v353_v23 = vpop.f32.mrf.mxu3 }
 0x12c   :  { %v855_v17 = vmul.f32 %v2156_v46, %v353_v23  ;;  %v2268_v5 = vmul.f32 %v653_v52, %v353_v23  ;;  %v2280_v28 = vmul.f32 %v353_v23, %v1872_v29  ;;  %v617_v8 = vpop.permute.xlu0 %616  ;;  %v661_v52 = vpop.permute.xlu2 %660 }
 0x12d   :  { %v296_v63 = vpop.f32.mrf.mxu1 }
 0x12e   :  { %490 = vrot.lane.b32.xlu1 %v2265_v26, %s1678_s14  ;;  %v2275_v49 = vmul.f32 %v615_v57, %v296_v63  ;;  %3139 = vst [vmem:[#allocation24_spill] sm:$0xff] %v2280_v28  ;;  %v150_v57 = vld [vmem:[%s3083_s4 + $0x98] sm:$0xff] }
 0x130   :  { %1578 = vmatmul.msk.f32.gmra.mxu1 %vm176_vm0, %v149_v19  ;;  %940 = vrot.lane.b32.xlu0 %v855_v17, %s1678_s14  ;;  %v836_v19 = vmul.f32 %v2128_v24, %v296_v63 }
 0x133   :  { %v356_v46 = vpop.f32.mrf.mxu3 }
 0x134   :  { %v856_v35 = vmul.f32 %v783_v44, %v356_v46  ;;  %v2282_v3 = vmul.f32 %v655_v42, %v356_v46  ;;  %v2295_v44 = vpop.permute.xlu1 %792  ;;  %v757_v17 = vpop.permute.xlu0 %756 }
 0x135   :  { %v299_v33 = vpop.f32.mrf.mxu1 }
 0x136   :  { %v837_v45 = vmul.f32 %v2113_v20, %v299_v33  ;;  %492 = vrot.lane.b32.xlu1 %v2280_v28, %s1678_s14  ;;  %942 = vrot.lane.b32.xlu2 %v856_v35, %s1678_s14  ;;  %v2291_v29 = vmul.f32 %v617_v8, %v299_v33  ;;  %v2300_v20 = vpop.permute.xlu2 %798 }
 0x137   :  { %3140 = vst [vmem:[#allocation25_spill] sm:$0xff] %v2300_v20 }
 0x138   :  { %1579 = vmatmul.msk.f32.gmra.mxu1 %vm176_vm0, %v150_v57  ;;  %904 = vrot.lane.b32.xlu0 %v837_v45, %s1678_s14  ;;  %v2314_v57 = vmul.f32 %v296_v63, %v1856_v27 }
 0x13a   :  { %3141 = vst [vmem:[#allocation26_spill] sm:$0xff] %v2314_v57 }
 0x13b   :  { %v2297_v23 = vpop.f32.mrf.mxu3 }
 0x13c   :  { %v857_v28 = vmul.f32 %v2162_v51, %v2297_v23  ;;  %v621_v24 = vpop.permute.xlu1 %620  ;;  %v2318_v51 = vpop.permute.xlu0 %758 }
 0x13d   :  { %v302_v42 = vpop.f32.mrf.mxu1  ;;  %3142 = vst [vmem:[#allocation27_spill] sm:$0xff] %v2318_v51 }
 0x13e   :  { %v838_v35 = vmul.f32 %v2190_v14, %v302_v42  ;;  %902 = vrot.lane.b32.xlu1 %v836_v19, %s1678_s14  ;;  %v2307_v8 = vmul.f32 %v2217_v54, %v302_v42  ;;  %v2329_v19 = vmul.f32 %v356_v46, %v1892_v31 }
 0x140   :  { %944 = vrot.lane.b32.xlu0 %v857_v28, %s1678_s14  ;;  %906 = vrot.lane.b32.xlu2 %v838_v35, %s1678_s14  ;;  %v663_v28 = vpop.permute.xlu2 %662  ;;  %3143 = vst [vmem:[#allocation28_spill] sm:$0xff] %v2329_v19 }
 0x143   :  { %v2311_v45 = vpop.f32.mrf.mxu3 }
 0x144   :  { %v2333_v27 = vmul.f32 %v2240_v36, %v2311_v45  ;;  %v625_v36 = vpop.permute.xlu0 %624 }
 0x145   :  { %v2316_v20 = vpop.f32.mrf.mxu1 }
 0x146   :  { %v839_v14 = vmul.f32 %v2200_v43, %v2316_v20  ;;  %454 = vrot.lane.b32.xlu1 %v2314_v57, %s1678_s14  ;;  %v2325_v54 = vmul.f32 %v621_v24, %v2316_v20 }
 0x148   :  { %908 = vrot.lane.b32.xlu2 %v839_v14, %s1678_s14  ;;  %v657_v14 = vpop.permute.xlu1 %656 }
 0x149   :  { %v2351_v46 = vmul.f32 %v657_v14, %v2297_v23 }
 0x14b   :  { %v2335_v63 = vpop.f32.mrf.mxu3 }
 0x14c   :  { %v2338_v43 = vmul.f32 %v661_v52, %v2335_v63  ;;  %v2354_v52 = vpop.permute.xlu2 %800  ;;  %v627_v14 = vpop.permute.xlu0 %626 }
 0x14d   :  { %v2340_v35 = vpop.f32.mrf.mxu1  ;;  %3145 = vst [vmem:[#allocation30_spill] sm:$0xff] %v2354_v52 }
 0x14e   :  { %3144 = vst [vmem:[#allocation29_spill] sm:$0xff] %v2340_v35  ;;  %v840_v24 = vmul.f32 %v2222_v41, %v2340_v35  ;;  %494 = vrot.lane.b32.xlu1 %v2329_v19, %s1678_s14  ;;  %v2348_v31 = vmul.f32 %v2225_v47, %v2340_v35  ;;  %v2359_v41 = vmul.f32 %v299_v33, %v1901_v32 }
 0x14f   :  { %v2377_v33 = vmul.f32 %v302_v42, %v1885_v30  ;;  %v858_v30 = vmul.f32 %v2215_v22, %v2311_v45 }
 0x150   :  { %910 = vrot.lane.b32.xlu0 %v840_v24, %s1678_s14 }
 0x151   :  { %3146 = vst [vmem:[#allocation31_spill] sm:$0xff] %v2377_v33 }
 0x153   :  { %v2356_v57 = vpop.f32.mrf.mxu3 }
 0x154   :  { %v2362_v19 = vmul.f32 %v663_v28, %v2356_v57  ;;  %v665_v32 = vpop.permute.xlu2 %664  ;;  %v860_v22 = vmul.f32 %v2209_v13, %v2356_v57  ;;  %v2425_v13 = vpop.permute.xlu1 %794 }
 0x155   :  { %v2364_v51 = vpop.f32.mrf.mxu1 }
 0x156   :  { %v841_v47 = vmul.f32 %v2195_v21, %v2364_v51  ;;  %456 = vrot.lane.b32.xlu1 %v2359_v41, %s1678_s14  ;;  %v2371_v24 = vmul.f32 %v625_v36, %v2364_v51 }
 0x158   :  { %912 = vrot.lane.b32.xlu0 %v841_v47, %s1678_s14  ;;  %v629_v47 = vpop.permute.xlu0 %628 }
 0x15b   :  { %v2374_v52 = vpop.f32.mrf.mxu3 }
 0x15c   :  { %v2380_v28 = vmul.f32 %v665_v32, %v2374_v52 }
 0x15d   :  { %v2382_v35 = vpop.f32.mrf.mxu1 }
 0x15e   :  { %3147 = vst [vmem:[#allocation32_spill] sm:$0xff] %v2380_v28  ;;  %v842_v21 = vmul.f32 %v2247_v59, %v2382_v35  ;;  %458 = vrot.lane.b32.xlu1 %v2377_v33, %s1678_s14  ;;  %v2389_v36 = vmul.f32 %v627_v14, %v2382_v35  ;;  %v859_v14 = vmul.f32 %v2259_v39, %v2335_v63 }
 0x160   :  { %914 = vrot.lane.b32.xlu0 %v842_v21, %s1678_s14 }
 0x165   :  { %v2394_v42 = vpop.f32.mrf.mxu1 }
 0x166   :  { %3148 = vst [vmem:[#allocation33_spill] sm:$0xff] %v2394_v42  ;;  %v843_v32 = vmul.f32 %v757_v17, %v2394_v42  ;;  %946 = vrot.lane.b32.xlu1 %v858_v30, %s1678_s14  ;;  %v2399_v59 = vmul.f32 %v629_v47, %v2394_v42 }
 0x168   :  { %916 = vrot.lane.b32.xlu0 %v843_v32, %s1678_s14 }
 0x16d   :  { %v2404_v28 = vpop.f32.mrf.mxu1 }
 0x16e   :  { %948 = vrot.lane.b32.xlu1 %v859_v14, %s1678_s14 }
 0x175   :  { %v2409_v21 = vpop.f32.mrf.mxu1 }
 0x176   :  { %950 = vrot.lane.b32.xlu1 %v860_v22, %s1678_s14  ;;  %v2440_v22 = vpop.permute.xlu1 %760 }
 0x17d   :  { %v2412_v17 = vpop.f32.mrf.mxu1 }
 0x17e   :  { %v2416_v47 = vmul.f32 %v2412_v17, %v1743_v4  ;;  %v846_v39 = vmul.f32 %v2010_v50, %v2412_v17 }
 0x180   :  { %922 = vrot.lane.b32.xlu1 %v846_v39, %s1678_s14  ;;  %474 = vrot.lane.b32.xlu2 %v2416_v47, %s1678_s14  ;;  %v2443_v39 = vpop.permute.xlu2 %450 }
 0x185   :  { %v2423_v30 = vpop.f32.mrf.mxu1 }
 0x186   :  { %v2429_v32 = vmul.f32 %v2423_v30, %v1773_v10  ;;  %v847_v4 = vmul.f32 %v2035_v56, %v2423_v30 }
 0x188   :  { %3149 = vst [vmem:[#allocation34_spill] sm:$0xff] %v2429_v32  ;;  %924 = vrot.lane.b32.xlu2 %v847_v4, %s1678_s14  ;;  %476 = vrot.lane.b32.xlu1 %v2429_v32, %s1678_s14 }
 0x18d   :  { %v2436_v50 = vpop.f32.mrf.mxu1 }
 0x18e   :  { %v848_v14 = vmul.f32 %v2031_v55, %v2436_v50  ;;  %v2448_v56 = vmul.f32 %v2436_v50, %v1753_v6  ;;  %v901_v6 = vpop.permute.xlu2 %900 }
 0x190   :  { %926 = vrot.lane.b32.xlu0 %v848_v14, %s1678_s14  ;;  %3150 = vst [vmem:[#allocation35_spill] sm:$0xff] %v2448_v56 }
 0x192   :  { %v899_v10 = vpop.permute.xlu0 %898 }
 0x193   :  { %v994_v42 = vadd.f32 %v899_v10, %v2234_v38 }
 0x195   :  { %1058 = vrot.lane.b32.xlu2 %v994_v42, %s1677_s17  ;;  %v2451_v4 = vpop.f32.mrf.mxu1 }
 0x196   :  { %v849_v55 = vmul.f32 %v2054_v61, %v2451_v4  ;;  %v2460_v38 = vmul.f32 %v2451_v4, %v1781_v12  ;;  %v995_v61 = vadd.f32 %v901_v6, %v2254_v62 }
 0x198   :  { %v939_v32 = vpop.permute.xlu1 %938  ;;  %478 = vrot.lane.b32.xlu0 %v2448_v56, %s1678_s14  ;;  %928 = vrot.lane.b32.xlu1 %v849_v55, %s1678_s14  ;;  %3151 = vst [vmem:[#allocation36_spill] sm:$0xff] %v2460_v38 }
 0x199   :  { %v1014_v55 = vadd.f32 %v939_v32, %v2242_v34 }
 0x19a   :  { %v2462_v14 = vpop.permute.xlu0 %452 }
 0x19d   :  { %480 = vrot.lane.b32.xlu2 %v2460_v38, %s1678_s14  ;;  %v2466_v42 = vpop.f32.mrf.mxu1 }
 0x19e   :  { %v2471_v10 = vmul.f32 %v2466_v42, %v1760_v7 }
 0x1a0   :  { %3152 = vst [vmem:[#allocation37_spill] sm:$0xff] %v2471_v10  ;;  %v2473_v56 = vpop.permute.xlu1 %490  ;;  %1060 = vrot.lane.b32.xlu0 %v995_v61, %s1677_s17  ;;  %482 = vrot.lane.b32.xlu1 %v2471_v10, %s1678_s14  ;;  %v850_v61 = vmul.f32 %v1999_v48, %v2466_v42 }
 0x1a2   :  { %v941_v12 = vpop.permute.xlu0 %940 }
 0x1a3   :  { %v1015_v33 = vadd.f32 %v941_v12, %v2268_v5 }
 0x1a5   :  { %1098 = vrot.lane.b32.xlu2 %v1014_v55, %s1677_s17  ;;  %v2480_v38 = vpop.f32.mrf.mxu1 }
 0x1a6   :  { %v851_v62 = vmul.f32 %v2066_v0, %v2480_v38 }
 0x1a8   :  { %v2484_v6 = vpop.permute.xlu1 %492  ;;  %932 = vrot.lane.b32.xlu1 %v851_v62, %s1678_s14 }
 0x1aa   :  { %v905_v7 = vpop.permute.xlu0 %904 }
 0x1ad   :  { %930 = vrot.lane.b32.xlu2 %v850_v61, %s1678_s14  ;;  %v2490_v10 = vpop.f32.mrf.mxu1  ;;  %v2507_v61 = vmul.f32 %v2480_v38, %v1801_v16 }
 0x1af   :  { %3154 = vst [vmem:[#allocation39_spill] sm:$0xff] %v2507_v61 }
 0x1b0   :  { %v903_v34 = vpop.permute.xlu1 %902 }
 0x1b1   :  { %v996_v32 = vadd.f32 %v903_v34, %v2275_v49 }
 0x1b2   :  { %v945_v55 = vpop.permute.xlu0 %944 }
 0x1b3   :  { %v2495_v0 = vadd.f32 %v945_v55, %v2351_v46  ;;  %1062 = vrot.lane.b32.xlu0 %v996_v32, %s1677_s17  ;;  %v943_v46 = vpop.permute.xlu2 %942 }
 0x1b5   :  { %1100 = vrot.lane.b32.xlu2 %v1015_v33, %s1677_s17  ;;  %v2499_v62 = vpop.f32.mrf.mxu1  ;;  %v997_v33 = vadd.f32 %v905_v7, %v2291_v29  ;;  %v2537_v29 = vmul.f32 %v2490_v10, %v1809_v18 }
 0x1b6   :  { %v2503_v48 = vmul.f32 %v2499_v62, %v1840_v25  ;;  %v853_v5 = vmul.f32 %v2070_v1, %v2499_v62  ;;  %v852_v1 = vmul.f32 %v2076_v2, %v2490_v10 }
 0x1b7   :  { %3156 = vst [vmem:[#allocation41_spill] sm:$0xff] %v2537_v29 }
 0x1b8   :  { %3153 = vst [vmem:[#allocation38_spill] sm:$0xff] %v2503_v48  ;;  %v2509_v49 = vpop.permute.xlu1 %454  ;;  %488 = vrot.lane.b32.xlu1 %v2503_v48, %s1678_s14 }
 0x1bb   :  { %484 = vrot.lane.b32.xlu0 %v2507_v61, %s1678_s14  ;;  %v907_v34 = vpop.permute.xlu2 %906 }
 0x1bd   :  { %936 = vrot.lane.b32.xlu2 %v853_v5, %s1678_s14 }
 0x1c0   :  { %v2518_v25 = vpop.permute.xlu1 %494 }
 0x1c1   :  { %3155 = vst [vmem:[#allocation40_spill] sm:$0xff] %v2518_v25 }
 0x1c2   :  { %v911_v16 = vpop.permute.xlu0 %910 }
 0x1c3   :  { %v2522_v12 = vadd.f32 %v911_v16, %v2348_v31  ;;  %1064 = vrot.lane.b32.xlu0 %v997_v33, %s1677_s17  ;;  %v163_v31 = vld [vmem:[%s3084_s5] sm:$0xff]  ;;  %v909_v7 = vpop.permute.xlu2 %908 }
 0x1c4   :  { %1330 = vmatpush.msrb.mxu0 %v163_v31  ;;  %1625 = vmatpush.msra.mxu2 %v163_v31 }
 0x1c8   :  { %v2525_v32 = vpop.permute.xlu1 %456 }
 0x1ca   :  { %v913_v55 = vpop.permute.xlu0 %912 }
 0x1cb   :  { %v2530_v5 = vadd.f32 %v913_v55, %v2371_v24  ;;  %934 = vrot.lane.b32.xlu0 %v852_v1, %s1678_s14 }
 0x1d0   :  { %v2533_v48 = vpop.permute.xlu1 %458 }
 0x1d2   :  { %v915_v33 = vpop.permute.xlu0 %914 }
 0x1d3   :  { %v2543_v2 = vadd.f32 %v915_v33, %v2389_v36  ;;  %486 = vrot.lane.b32.xlu0 %v2537_v29, %s1678_s14  ;;  %v719_v36 = vmul.f32 %v2091_v9, %v2423_v30  ;;  %v99_v9 = vld [vmem:[%s3082_s3] sm:$0xff] }
 0x1d8   :  { %v947_v24 = vpop.permute.xlu1 %946 }
 0x1d9   :  { %v2548_v16 = vadd.f32 %v947_v24, %v2333_v27  ;;  %v1016_v24 = vadd.f32 %v943_v46, %v2282_v3  ;;  %v998_v3 = vadd.f32 %v907_v34, %v2307_v8  ;;  %v722_v8 = vmul.f32 %v2170_v58, %v2466_v42  ;;  %v3157_v58 = vld [vmem:[#allocation24_spill] sm:$0xff] }
 0x1da   :  { %v917_v18 = vpop.permute.xlu0 %916  ;;  %v2550_v1 = vpop.permute.xlu2 %474  ;;  %v721_v34 = vmul.f32 %v2093_v11, %v2451_v4  ;;  %v567_v42 = vsub.f32 %v3157_v58, %v2484_v6  ;;  %v3158_v4 = vld [vmem:[#allocation22_spill] sm:$0xff] }
 0x1db   :  { %v2553_v55 = vadd.f32 %v917_v18, %v2399_v59 }
 0x1e0   :  { %v949_v61 = vpop.permute.xlu1 %948 }
 0x1e1   :  { %v2556_v25 = vadd.f32 %v949_v61, %v2338_v43  ;;  %v546_v43 = vsub.f32 %v2231_v40, %v2443_v39  ;;  %v566_v39 = vsub.f32 %v2265_v26, %v2473_v56 }
 0x1e2   :  { %v925_v31 = vpop.permute.xlu2 %924 }
 0x1e3   :  { %v1007_v33 = vadd.f32 %v925_v31, %v719_v36 }
 0x1e5   :  { %1084 = vrot.lane.b32.xlu1 %v1007_v33, %s1677_s17 }
 0x1e8   :  { %v951_v29 = vpop.permute.xlu1 %950 }
 0x1e9   :  { %v2562_v27 = vadd.f32 %v951_v29, %v2362_v19  ;;  %v718_v19 = vmul.f32 %v2020_v53, %v2412_v17  ;;  %v720_v17 = vmul.f32 %v2105_v15, %v2436_v50  ;;  %v861_v50 = vmul.f32 %v2295_v44, %v2374_v52  ;;  %v100_v44 = vld [vmem:[%s3082_s3 + $0x8] sm:$0xff] }
 0x1ed   :  { %1102 = vrot.lane.b32.xlu1 %v1016_v24, %s1677_s17 }
 0x1ef   :  { %v1059_v59 = vpop.permute.xlu2 %1058 }
 0x1f0   :  { %v1155_v30 = vsel %vm1154_vm1, %v546_v43, %v1059_v59  ;;  %v999_v59 = vadd.f32 %v909_v7, %v2325_v54  ;;  %v3160_v54 = vld [vmem:[#allocation27_spill] sm:$0xff] }
 0x1f1   :  { %v1187_v61 = vadd.f32 %v1155_v30, %v99_v9  ;;  %v547_v30 = vsub.f32 %v3158_v4, %v2462_v14  ;;  %v844_v7 = vmul.f32 %v3160_v54, %v2404_v28  ;;  %v3161_v14 = vld [vmem:[#allocation20_spill] sm:$0xff] }
 0x1f2   :  { %v923_v29 = vpop.permute.xlu1 %922  ;;  %v3167_v4 = vld [vmem:[#allocation8_spill] sm:$0xff] }
 0x1f3   :  { %v1006_v18 = vadd.f32 %v923_v29, %v718_v19  ;;  %1592 = vmatmul.msk.f32.vlgmr.msrb.gmra.mxu0 %vm176_vm0, %v1187_v61  ;;  %v3159_v29 = vld [vmem:[#allocation5_spill] sm:$0xff] }
 0x1f4   :  { %v2621_v6 = vmul.f32 %v2316_v20, %v3159_v29  ;;  %v3168_v29 = vld [vmem:[#allocation15_spill] sm:$0xff] }
 0x1f5   :  { %1082 = vrot.lane.b32.xlu2 %v1006_v18, %s1677_s17  ;;  %666 = vrot.lane.b32.xlu1 %v2135_v37, %s1678_s14 }
 0x1f7   :  { %v2578_v40 = vpop.permute.xlu2 %480 }
 0x1fa   :  { %v2589_v36 = vpop.permute.xlu1 %476 }
 0x1fd   :  { %1066 = vrot.lane.b32.xlu2 %v998_v3, %s1677_s17 }
 0x1ff   :  { %v1099_v46 = vpop.permute.xlu2 %1098 }
 0x200   :  { %v2585_v53 = vsel %vm1154_vm1, %v566_v39, %v1099_v46  ;;  %v723_v39 = vmul.f32 %v3161_v14, %v2480_v38  ;;  %v2632_v46 = vpop.f32.mrf.mxu3  ;;  %v3165_v38 = vld [vmem:[#allocation26_spill] sm:$0xff]  ;;  %v3171_v14 = vld [vmem:[#allocation9_spill] sm:$0xff] }
 0x202   :  { %v927_v31 = vpop.permute.xlu0 %926 }
 0x203   :  { %v1008_v33 = vadd.f32 %v927_v31, %v720_v17  ;;  %v862_v17 = vmul.f32 %v2425_v13, %v2632_v46  ;;  %v101_v13 = vld [vmem:[%s3082_s3 + $0x10] sm:$0xff] }
 0x205   :  { %1086 = vrot.lane.b32.xlu0 %v1008_v33, %s1677_s17  ;;  %630 = vrot.lane.b32.xlu2 %v2050_v60, %s1678_s14  ;;  %v3162_v33 = vld [vmem:[#allocation7_spill] sm:$0xff] }
 0x207   :  { %v931_v26 = vpop.permute.xlu2 %930 }
 0x208   :  { %v1010_v56 = vadd.f32 %v931_v26, %v722_v8  ;;  %v2640_v8 = vmul.f32 %v2297_v23, %v3162_v33  ;;  %v3163_v26 = vld [vmem:[#allocation6_spill] sm:$0xff] }
 0x20a   :  { %v2598_v24 = vpop.permute.xlu0 %478  ;;  %v929_v15 = vpop.permute.xlu1 %928  ;;  %1090 = vrot.lane.b32.xlu1 %v1010_v56, %s1677_s17  ;;  %v3164_v56 = vld [vmem:[#allocation29_spill] sm:$0xff] }
 0x20b   :  { %v1009_v43 = vadd.f32 %v929_v15, %v721_v34  ;;  %v2644_v34 = vmul.f32 %v3164_v56, %v3163_v26  ;;  %v548_v15 = vsub.f32 %v3165_v38, %v2509_v49  ;;  %v3177_v38 = vld [vmem:[#allocation34_spill] sm:$0xff] }
 0x20d   :  { %952 = vrot.lane.b32.xlu0 %v861_v50, %s1678_s14  ;;  %1088 = vrot.lane.b32.xlu2 %v1009_v43, %s1677_s17 }
 0x20f   :  { %v1101_v9 = vpop.permute.xlu2 %1100 }
 0x210   :  { %v2609_v11 = vsel %vm1154_vm1, %v567_v42, %v1101_v9  ;;  %v3166_v42 = vld [vmem:[#allocation21_spill] sm:$0xff] }
 0x211   :  { %v725_v9 = vmul.f32 %v3166_v42, %v2499_v62  ;;  %v102_v62 = vld [vmem:[%s3082_s3 + $0x18] sm:$0xff] }
 0x212   :  { %v1061_v61 = vpop.permute.xlu0 %1060  ;;  %v2616_v19 = vpop.permute.xlu1 %482  ;;  %1068 = vrot.lane.b32.xlu1 %v999_v59, %s1677_s17 }
 0x213   :  { %v1156_v18 = vsel %vm1154_vm1, %v547_v30, %v1061_v61  ;;  %v2666_v30 = vmul.f32 %v2311_v45, %v3167_v4  ;;  %v3169_v45 = vld [vmem:[#allocation17_spill] sm:$0xff] }
 0x214   :  { %v1188_v3 = vadd.f32 %v1156_v18, %v100_v44  ;;  %v549_v44 = vsub.f32 %v2359_v41, %v2525_v32  ;;  %v3170_v18 = vld [vmem:[#allocation11_spill] sm:$0xff] }
 0x215   :  { %460 = vrot.lane.b32.xlu0 %v2621_v6, %s1678_s14  ;;  %918 = vrot.lane.b32.xlu2 %v844_v7, %s1678_s14  ;;  %v724_v7 = vmul.f32 %v3169_v45, %v2490_v10  ;;  %v3172_v10 = vld [vmem:[#allocation18_spill] sm:$0xff] }
 0x216   :  { %1593 = vmatmul.msk.f32.gmra.mxu0 %vm176_vm0, %v1188_v3  ;;  %v2688_v3 = vmul.f32 %v2335_v63, %v3170_v18  ;;  %v845_v63 = vmul.f32 %v2440_v22, %v2409_v21  ;;  %v3174_v22 = vld [vmem:[#allocation10_spill] sm:$0xff] }
 0x217   :  { %v937_v58 = vpop.permute.xlu2 %936  ;;  %v2721_v33 = vmul.f32 %v2382_v35, %v3174_v22  ;;  %v559_v35 = vsub.f32 %v3177_v38, %v2589_v36  ;;  %v3178_v36 = vld [vmem:[#allocation40_spill] sm:$0xff] }
 0x218   :  { %v1013_v49 = vadd.f32 %v937_v58, %v725_v9  ;;  %v3179_v9 = vld [vmem:[#allocation28_spill] sm:$0xff] }
 0x21a   :  { %v933_v20 = vpop.permute.xlu1 %932 }
 0x21b   :  { %v1011_v31 = vadd.f32 %v933_v20, %v723_v39  ;;  %v2692_v39 = vmul.f32 %v2364_v51, %v3171_v14  ;;  %v558_v51 = vsub.f32 %v2416_v47, %v2550_v1  ;;  %v2723_v47 = vpop.f32.mrf.mxu3  ;;  %v3175_v1 = vld [vmem:[#allocation23_spill] sm:$0xff] }
 0x21c   :  { %v863_v26 = vmul.f32 %v3175_v1, %v2723_v47  ;;  %v3184_v14 = vld [vmem:[#allocation19_spill] sm:$0xff] }
 0x21d   :  { %1092 = vrot.lane.b32.xlu0 %v1011_v31, %s1677_s17  ;;  %954 = vrot.lane.b32.xlu2 %v862_v17, %s1678_s14  ;;  %v3173_v31 = vld [vmem:[#allocation12_spill] sm:$0xff] }
 0x225   :  { %v1063_v50 = vpop.permute.xlu0 %1062  ;;  %496 = vrot.lane.b32.xlu0 %v2640_v8, %s1678_s14  ;;  %462 = vrot.lane.b32.xlu2 %v2644_v34, %s1678_s14 }
 0x226   :  { %v1157_v23 = vsel %vm1154_vm1, %v548_v15, %v1063_v50  ;;  %v103_v15 = vld [vmem:[%s3082_s3 + $0x20] sm:$0xff] }
 0x227   :  { %v1189_v43 = vadd.f32 %v1157_v23, %v101_v13  ;;  %v112_v13 = vld [vmem:[%s3082_s3 + $0x68] sm:$0xff] }
 0x229   :  { %1594 = vmatmul.msk.f32.gmra.mxu0 %vm176_vm0, %v1189_v43 }
 0x22d   :  { %v2659_v59 = vpop.permute.xlu0 %484  ;;  %1104 = vrot.lane.b32.xlu0 %v2495_v0, %s1677_s17  ;;  %1096 = vrot.lane.b32.xlu2 %v1013_v49, %s1677_s17  ;;  %v568_v49 = vsub.f32 %v3179_v9, %v3178_v36  ;;  %v115_v36 = vld [vmem:[%s3082_s3 + $0x80] sm:$0xff] }
 0x235   :  { %v1065_v61 = vpop.permute.xlu0 %1064  ;;  %668 = vrot.lane.b32.xlu0 %v3168_v29, %s1678_s14  ;;  %498 = vrot.lane.b32.xlu2 %v2666_v30, %s1678_s14 }
 0x236   :  { %v1158_v0 = vsel %vm1154_vm1, %v549_v44, %v1065_v61  ;;  %v3180_v61 = vld [vmem:[#allocation16_spill] sm:$0xff] }
 0x237   :  { %v1190_v54 = vadd.f32 %v1158_v0, %v102_v62  ;;  %v3181_v0 = vld [vmem:[#allocation14_spill] sm:$0xff] }
 0x239   :  { %1595 = vmatmul.msk.f32.gmra.mxu0 %vm176_vm0, %v1190_v54  ;;  %v3182_v54 = vld [vmem:[#allocation33_spill] sm:$0xff] }
 0x23a   :  { %v2760_v45 = vmul.f32 %v3182_v54, %v3181_v0 }
 0x23d   :  { %v935_v41 = vpop.permute.xlu0 %934  ;;  %1070 = vrot.lane.b32.xlu0 %v2522_v12, %s1677_s17  ;;  %1106 = vrot.lane.b32.xlu2 %v2548_v16, %s1677_s17  ;;  %v111_v12 = vld [vmem:[%s3082_s3 + $0x60] sm:$0xff]  ;;  %v2711_v16 = vpop.permute.xlu1 %488 }
 0x23e   :  { %v1012_v32 = vadd.f32 %v935_v41, %v724_v7  ;;  %v2762_v7 = vpop.f32.mrf.mxu3 }
 0x240   :  { %1094 = vrot.lane.b32.xlu1 %v1012_v32, %s1677_s17  ;;  %v2773_v32 = vmul.f32 %v2632_v46, %v2135_v37  ;;  %v3185_v37 = vld [vmem:[#allocation30_spill] sm:$0xff] }
 0x245   :  { %464 = vrot.lane.b32.xlu0 %v2692_v39, %s1678_s14  ;;  %500 = vrot.lane.b32.xlu2 %v2688_v3, %s1678_s14  ;;  %v2777_v18 = vpop.permute.xlu0 %486 }
 0x248   :  { %632 = vrot.lane.b32.xlu1 %v3172_v10, %s1678_s14 }
 0x24d   :  { %1072 = vrot.lane.b32.xlu0 %v2530_v5, %s1677_s17  ;;  %1108 = vrot.lane.b32.xlu2 %v2556_v25, %s1677_s17  ;;  %v2717_v25 = vmul.f32 %v2356_v57, %v3173_v31  ;;  %v3176_v57 = vld [vmem:[#allocation31_spill] sm:$0xff] }
 0x24e   :  { %v550_v56 = vsub.f32 %v3176_v57, %v2533_v48 }
 0x24f   :  { %v1083_v20 = vpop.permute.xlu2 %1082 }
 0x250   :  { %v1167_v17 = vsel %vm1154_vm1, %v558_v51, %v1083_v20  ;;  %920 = vrot.lane.b32.xlu1 %v845_v63, %s1678_s14  ;;  %v2785_v63 = vpop.f32.mrf.mxu3  ;;  %v3186_v20 = vld [vmem:[#allocation35_spill] sm:$0xff] }
 0x251   :  { %v1199_v5 = vadd.f32 %v1167_v17, %v111_v12  ;;  %v865_v12 = vmul.f32 %v3185_v37, %v2785_v63  ;;  %v560_v17 = vsub.f32 %v3186_v20, %v2598_v24  ;;  %v114_v24 = vld [vmem:[%s3082_s3 + $0x78] sm:$0xff]  ;;  %v116_v37 = vld [vmem:[%s3082_s3 + $0x88] sm:$0xff]  ;;  %v2843_v20 = vmul.f32 %v2723_v47, %v3168_v29 }
 0x253   :  { %1604 = vmatmul.msk.f32.vlgmr.msra.gmra.mxu2 %vm176_vm0, %v1199_v5  ;;  %v113_v5 = vld [vmem:[%s3082_s3 + $0x70] sm:$0xff] }
 0x255   :  { %466 = vrot.lane.b32.xlu0 %v2721_v33, %s1678_s14  ;;  %502 = vrot.lane.b32.xlu2 %v2717_v25, %s1678_s14 }
 0x257   :  { %v1067_v50 = vpop.permute.xlu2 %1066  ;;  %v1085_v23 = vpop.permute.xlu1 %1084 }
 0x258   :  { %v1159_v43 = vsel %vm1154_vm1, %v550_v56, %v1067_v50  ;;  %v1168_v58 = vsel %vm1154_vm1, %v559_v35, %v1085_v23  ;;  %956 = vrot.lane.b32.xlu1 %v863_v26, %s1678_s14  ;;  %v3187_v26 = vld [vmem:[#allocation36_spill] sm:$0xff]  ;;  %v3188_v56 = vld [vmem:[#allocation13_spill] sm:$0xff] }
 0x259   :  { %v1191_v48 = vadd.f32 %v1159_v43, %v103_v15  ;;  %v1200_v42 = vadd.f32 %v1168_v58, %v112_v13  ;;  %v561_v57 = vsub.f32 %v3187_v26, %v2578_v40  ;;  %v2803_v38 = vmul.f32 %v2374_v52, %v3188_v56  ;;  %v3189_v23 = vld [vmem:[#allocation32_spill] sm:$0xff]  ;;  %v3190_v52 = vld [vmem:[#allocation37_spill] sm:$0xff] }
 0x25a   :  { %v562_v40 = vsub.f32 %v3190_v52, %v2616_v19 }
 0x25b   :  { %1596 = vmatmul.msk.f32.gmra.mxu0 %vm176_vm0, %v1191_v48  ;;  %1605 = vmatmul.msk.f32.gmra.mxu2 %vm176_vm0, %v1200_v42  ;;  %v2818_v48 = vmul.f32 %v2404_v28, %v2050_v60  ;;  %v104_v60 = vld [vmem:[%s3082_s3 + $0x28] sm:$0xff] }
 0x25d   :  { %1074 = vrot.lane.b32.xlu0 %v2543_v2, %s1677_s17  ;;  %1110 = vrot.lane.b32.xlu2 %v2562_v27, %s1677_s17  ;;  %v3183_v2 = vld [vmem:[#allocation25_spill] sm:$0xff] }
 0x25e   :  { %v864_v27 = vmul.f32 %v3183_v2, %v2762_v7 }
 0x25f   :  { %v1103_v4 = vpop.permute.xlu1 %1102  ;;  %v631_v44 = vpop.permute.xlu2 %630 }
 0x260   :  { %v2754_v62 = vsel %vm1154_vm1, %v568_v49, %v1103_v4  ;;  %670 = vrot.lane.b32.xlu1 %v3180_v61, %s1678_s14  ;;  %v716_v42 = vmul.f32 %v631_v44, %v2404_v28 }
 0x265   :  { %468 = vrot.lane.b32.xlu0 %v2760_v45, %s1678_s14  ;;  %1076 = vrot.lane.b32.xlu2 %v2553_v55, %s1677_s17  ;;  %v2783_v55 = vmul.f32 %v2409_v21, %v3172_v10 }
 0x267   :  { %v1089_v41 = vpop.permute.xlu2 %1088  ;;  %v667_v31 = vpop.permute.xlu1 %666 }
 0x268   :  { %958 = vrot.lane.b32.xlu1 %v864_v27, %s1678_s14  ;;  %v1170_v35 = vsel %vm1154_vm1, %v561_v57, %v1089_v41  ;;  %v734_v27 = vmul.f32 %v667_v31, %v2632_v46  ;;  %v2854_v31 = vmul.f32 %v2762_v7, %v3180_v61  ;;  %v105_v57 = vld [vmem:[%s3082_s3 + $0x30] sm:$0xff] }
 0x269   :  { %v1202_v58 = vadd.f32 %v1170_v35, %v114_v24  ;;  %v3192_v24 = vld [vmem:[#allocation41_spill] sm:$0xff] }
 0x26a   :  { %v564_v35 = vsub.f32 %v3192_v24, %v2777_v18  ;;  %v118_v18 = vld [vmem:[%s3082_s3 + $0x98] sm:$0xff] }
 0x26d   :  { %506 = vrot.lane.b32.xlu2 %v2773_v32, %s1678_s14 }
 0x26f   :  { %v919_v51 = vpop.permute.xlu2 %918 }
 0x270   :  { %672 = vrot.lane.b32.xlu1 %v3184_v14, %s1678_s14  ;;  %v1004_v4 = vadd.f32 %v919_v51, %v716_v42 }
 0x275   :  { %472 = vrot.lane.b32.xlu2 %v2783_v55, %s1678_s14 }
 0x277   :  { %v1087_v22 = vpop.permute.xlu0 %1086  ;;  %v955_v15 = vpop.permute.xlu2 %954 }
 0x278   :  { %v1169_v10 = vsel %vm1154_vm1, %v560_v17, %v1087_v22  ;;  %960 = vrot.lane.b32.xlu1 %v865_v12, %s1678_s14  ;;  %v1022_v51 = vadd.f32 %v955_v15, %v734_v27 }
 0x279   :  { %v1201_v1 = vadd.f32 %v1169_v10, %v113_v5 }
 0x27b   :  { %1606 = vmatmul.msk.f32.gmra.mxu2 %vm176_vm0, %v1201_v1 }
 0x27c   :  { %v1091_v13 = vpop.permute.xlu1 %1090 }
 0x27d   :  { %v1171_v9 = vsel %vm1154_vm1, %v562_v40, %v1091_v13 }
 0x27e   :  { %v1203_v19 = vadd.f32 %v1171_v9, %v115_v36 }
 0x27f   :  { %v953_v50 = vpop.permute.xlu0 %952  ;;  %v463_v54 = vpop.permute.xlu2 %462 }
 0x280   :  { %v1021_v43 = vadd.f32 %v953_v50, %v3189_v23  ;;  %504 = vrot.lane.b32.xlu1 %v2803_v38, %s1678_s14  ;;  %v552_v26 = vsub.f32 %v2644_v34, %v463_v54  ;;  %v117_v50 = vld [vmem:[%s3082_s3 + $0x90] sm:$0xff] }
 0x282   :  { %1112 = vrot.lane.b32.xlu0 %v1021_v43, %s1677_s17 }
 0x283   :  { %1607 = vmatmul.msk.f32.gmra.mxu2 %vm176_vm0, %v1202_v58  ;;  %v3193_v58 = vld [vmem:[#allocation38_spill] sm:$0xff] }
 0x284   :  { %v1069_v28 = vpop.permute.xlu1 %1068  ;;  %v565_v52 = vsub.f32 %v3193_v58, %v2711_v16 }
 0x287   :  { %v461_v49 = vpop.permute.xlu0 %460  ;;  %v1097_v5 = vpop.permute.xlu2 %1096 }
 0x288   :  { %v551_v0 = vsub.f32 %v2621_v6, %v461_v49  ;;  %470 = vrot.lane.b32.xlu1 %v2818_v48, %s1678_s14  ;;  %v3191_v6 = vld [vmem:[#allocation39_spill] sm:$0xff]  ;;  %v1174_v42 = vsel %vm1154_vm1, %v565_v52, %v1097_v5 }
 0x289   :  { %v563_v41 = vsub.f32 %v3191_v6, %v2659_v59  ;;  %v1206_v49 = vadd.f32 %v1174_v42, %v118_v18  ;;  %v124_v18 = vld [vmem:[%s3082_s3 + $0xc8] sm:$0xff] }
 0x28a   :  { %1078 = vrot.lane.b32.xlu0 %v1004_v4, %s1677_s17  ;;  %v1160_v44 = vsel %vm1154_vm1, %v551_v0, %v1069_v28  ;;  %v106_v0 = vld [vmem:[%s3082_s3 + $0x38] sm:$0xff] }
 0x28b   :  { %1608 = vmatmul.msk.f32.gmra.mxu2 %vm176_vm0, %v1203_v19  ;;  %v1192_v2 = vadd.f32 %v1160_v44, %v104_v60  ;;  %v119_v19 = vld [vmem:[%s3082_s3 + $0xa0] sm:$0xff] }
 0x28d   :  { %1597 = vmatmul.msk.f32.gmra.mxu0 %vm176_vm0, %v1192_v2 }
 0x28f   :  { %v1093_v12 = vpop.permute.xlu0 %1092  ;;  %v2858_v29 = vpop.permute.xlu2 %498 }
 0x290   :  { %v1172_v17 = vsel %vm1154_vm1, %v563_v41, %v1093_v12  ;;  %1114 = vrot.lane.b32.xlu1 %v1022_v51, %s1677_s17  ;;  %v120_v41 = vld [vmem:[%s3082_s3 + $0xa8] sm:$0xff] }
 0x291   :  { %v1204_v46 = vadd.f32 %v1172_v17, %v116_v37  ;;  %v1208_v12 = vadd.f32 %v2609_v11, %v120_v41  ;;  %v107_v17 = vld [vmem:[%s3082_s3 + $0x40] sm:$0xff] }
 0x292   :  { %508 = vrot.lane.b32.xlu0 %v2843_v20, %s1678_s14 }
 0x293   :  { %1609 = vmatmul.msk.f32.gmra.mxu2 %vm176_vm0, %v1204_v46 }
 0x297   :  { %v2850_v59 = vpop.permute.xlu0 %496  ;;  %v2862_v10 = vpop.permute.xlu2 %1106 }
 0x29a   :  { %510 = vrot.lane.b32.xlu0 %v2854_v31, %s1678_s14 }
 0x29f   :  { %v2860_v22 = vpop.permute.xlu0 %1104  ;;  %v2871_v15 = vpop.permute.xlu2 %500 }
 0x2a7   :  { %v669_v1 = vpop.permute.xlu0 %668  ;;  %v2885_v9 = vpop.permute.xlu2 %1108 }
 0x2a8   :  { %v735_v51 = vmul.f32 %v669_v1, %v2723_v47  ;;  %v121_v47 = vld [vmem:[%s3082_s3 + $0xb0] sm:$0xff] }
 0x2af   :  { %v1071_v56 = vpop.permute.xlu0 %1070  ;;  %v503_v27 = vpop.permute.xlu2 %502 }
 0x2b0   :  { %v1161_v61 = vsel %vm1154_vm1, %v552_v26, %v1071_v56  ;;  %v569_v56 = vsub.f32 %v2640_v8, %v2850_v59 }
 0x2b1   :  { %v1193_v13 = vadd.f32 %v1161_v61, %v105_v57  ;;  %v2918_v57 = vmul.f32 %v2785_v63, %v3184_v14  ;;  %v108_v14 = vld [vmem:[%s3082_s3 + $0x48] sm:$0xff] }
 0x2b2   :  { %v1095_v23 = vpop.permute.xlu1 %1094 }
 0x2b3   :  { %v1173_v34 = vsel %vm1154_vm1, %v564_v35, %v1095_v23  ;;  %1598 = vmatmul.msk.f32.gmra.mxu0 %vm176_vm0, %v1193_v13  ;;  %v122_v35 = vld [vmem:[%s3082_s3 + $0xb8] sm:$0xff] }
 0x2b4   :  { %v1205_v43 = vadd.f32 %v1173_v34, %v117_v50 }
 0x2b6   :  { %1610 = vmatmul.msk.f32.gmra.mxu2 %vm176_vm0, %v1205_v43  ;;  %v570_v43 = vsub.f32 %v2666_v30, %v2858_v29 }
 0x2b7   :  { %v465_v40 = vpop.permute.xlu0 %464  ;;  %v1111_v46 = vpop.permute.xlu2 %1110 }
 0x2b8   :  { %v553_v4 = vsub.f32 %v2692_v39, %v465_v40  ;;  %v1207_v39 = vadd.f32 %v2585_v53, %v119_v19  ;;  %v571_v40 = vsub.f32 %v2688_v3, %v2871_v15  ;;  %v125_v3 = vld [vmem:[%s3082_s3 + $0xd0] sm:$0xff]  ;;  %v126_v19 = vld [vmem:[%s3082_s3 + $0xd8] sm:$0xff] }
 0x2ba   :  { %v633_v36 = vpop.permute.xlu1 %632  ;;  %v1180_v30 = vsel %vm1154_vm1, %v571_v40, %v2885_v9 }
 0x2bb   :  { %v717_v54 = vmul.f32 %v633_v36, %v2409_v21 }
 0x2be   :  { %1611 = vmatmul.msk.f32.gmra.mxu2 %vm176_vm0, %v1206_v49  ;;  %v1212_v49 = vadd.f32 %v1180_v30, %v124_v18 }
 0x2bf   :  { %v1073_v16 = vpop.permute.xlu0 %1072  ;;  %v1077_v13 = vpop.permute.xlu2 %1076 }
 0x2c0   :  { %v1162_v60 = vsel %vm1154_vm1, %v553_v4, %v1073_v16  ;;  %v572_v4 = vsub.f32 %v2717_v25, %v503_v27 }
 0x2c1   :  { %v1194_v28 = vadd.f32 %v1162_v60, %v106_v0 }
 0x2c2   :  { %v921_v44 = vpop.permute.xlu1 %920  ;;  %v1181_v15 = vsel %vm1154_vm1, %v572_v4, %v1111_v46 }
 0x2c3   :  { %v1005_v2 = vadd.f32 %v921_v44, %v717_v54  ;;  %1599 = vmatmul.msk.f32.gmra.mxu0 %vm176_vm0, %v1194_v28  ;;  %v1213_v9 = vadd.f32 %v1181_v15, %v125_v3  ;;  %v109_v44 = vld [vmem:[%s3082_s3 + $0x50] sm:$0xff] }
 0x2c5   :  { %1080 = vrot.lane.b32.xlu1 %v1005_v2, %s1677_s17 }
 0x2c6   :  { %1612 = vmatmul.msk.f32.gmra.mxu2 %vm176_vm0, %v1207_v39 }
 0x2c7   :  { %v467_v6 = vpop.permute.xlu0 %466  ;;  %v507_v27 = vpop.permute.xlu2 %506 }
 0x2c8   :  { %v554_v53 = vsub.f32 %v2721_v33, %v467_v6  ;;  %v1209_v33 = vadd.f32 %v2754_v62, %v121_v47  ;;  %v1178_v62 = vsel %vm1154_vm1, %v569_v56, %v2860_v22  ;;  %v123_v22 = vld [vmem:[%s3082_s3 + $0xc0] sm:$0xff] }
 0x2ca   :  { %v957_v21 = vpop.permute.xlu1 %956 }
 0x2cb   :  { %v1023_v37 = vadd.f32 %v957_v21, %v735_v51  ;;  %v574_v51 = vsub.f32 %v2773_v32, %v507_v27 }
 0x2cd   :  { %1116 = vrot.lane.b32.xlu2 %v1023_v37, %s1677_s17 }
 0x2ce   :  { %1613 = vmatmul.msk.f32.gmra.mxu2 %vm176_vm0, %v1208_v12 }
 0x2cf   :  { %v1075_v5 = vpop.permute.xlu0 %1074  ;;  %v473_v32 = vpop.permute.xlu2 %472 }
 0x2d0   :  { %v1163_v26 = vsel %vm1154_vm1, %v554_v53, %v1075_v5 }
 0x2d1   :  { %v1195_v1 = vadd.f32 %v1163_v26, %v107_v17 }
 0x2d2   :  { %v671_v11 = vpop.permute.xlu1 %670 }
 0x2d3   :  { %1600 = vmatmul.msk.f32.gmra.mxu0 %vm176_vm0, %v1195_v1  ;;  %v736_v50 = vmul.f32 %v671_v11, %v2762_v7  ;;  %v1179_v7 = vsel %vm1154_vm1, %v570_v43, %v2862_v10  ;;  %v128_v11 = vld [vmem:[%s3082_s3 + $0xe8] sm:$0xff] }
 0x2d4   :  { %v1211_v52 = vadd.f32 %v1179_v7, %v123_v22  ;;  %v130_v22 = vld [vmem:[%s3082_s3 + $0xf8] sm:$0xff]  ;;  %v1332_v7 = vpop.f32.mrf.mxu0 }
 0x2d5   :  { %512 = vrot.lane.b32.xlu2 %v2918_v57, %s1678_s14 }
 0x2d6   :  { %1614 = vmatmul.msk.f32.gmra.mxu2 %vm176_vm0, %v1209_v33  ;;  %v1368_v10 = vpop.f32.mrf.mxu2 }
 0x2d7   :  { %v469_v61 = vpop.permute.xlu0 %468  ;;  %v1440_v26 = vmax.f32 %v1368_v10, 0.0 }
 0x2d8   :  { %v555_v24 = vsub.f32 %v2760_v45, %v469_v61  ;;  %v1210_v45 = vadd.f32 %v1178_v62, %v122_v35 }
 0x2da   :  { %v959_v23 = vpop.permute.xlu1 %958  ;;  %v1164_v8 = vsel %vm1154_vm1, %v555_v24, %v1077_v13  ;;  %v557_v24 = vsub.f32 %v2783_v55, %v473_v32  ;;  %v1679_v32 = vmov 0  }
 0x2db   :  { %v1024_v59 = vadd.f32 %v959_v23, %v736_v50  ;;  %v1196_v34 = vadd.f32 %v1164_v8, %v108_v14  ;;  %v110_v14 = vld [vmem:[%s3082_s3 + $0x58] sm:$0xff]  ;;  %v129_v23 = vld [vmem:[%s3082_s3 + $0xf0] sm:$0xff]  ;;  %1648 = vset.pattern.permute.xlu1 %v1679_v32  ;;  %1650 = vset.pattern.permute.xlu0 %v1679_v32 }
 0x2dc   :  { %v1335_v18 = vpop.f32.mrf.mxu0  ;;  %1649 = vset.pattern.permute.xlu2 %v1679_v32 }
 0x2dd   :  { %1601 = vmatmul.msk.f32.gmra.mxu0 %vm176_vm0, %v1196_v34  ;;  %1118 = vrot.lane.b32.xlu1 %v1024_v59, %s1677_s17 }
 0x2de   :  { %1615 = vmatmul.msk.f32.gmra.mxu2 %vm176_vm0, %v1210_v45  ;;  %v1371_v60 = vpop.f32.mrf.mxu2 }
 0x2df   :  { %v1441_v5 = vmax.f32 %v1371_v60, 0.0 }
 0x2e2   :  { %v673_v58 = vpop.permute.xlu1 %672 }
 0x2e3   :  { %v737_v29 = vmul.f32 %v673_v58, %v2785_v63 }
 0x2e6   :  { %1616 = vmatmul.msk.f32.gmra.mxu2 %vm176_vm0, %v1211_v52 }
 0x2ea   :  { %v961_v42 = vpop.permute.xlu1 %960 }
 0x2eb   :  { %v1025_v36 = vadd.f32 %v961_v42, %v737_v29  ;;  %v1338_v29 = vpop.f32.mrf.mxu0 }
 0x2ed   :  { %1120 = vrot.lane.b32.xlu0 %v1025_v36, %s1677_s17 }
 0x2ee   :  { %1617 = vmatmul.msk.f32.gmra.mxu2 %vm176_vm0, %v1212_v49 }
 0x2f2   :  { %v505_v0 = vpop.permute.xlu1 %504 }
 0x2f3   :  { %v573_v63 = vsub.f32 %v2803_v38, %v505_v0 }
 0x2f4   :  { %v1113_v16 = vpop.permute.xlu0 %1112 }
 0x2f5   :  { %v1182_v25 = vsel %vm1154_vm1, %v573_v63, %v1113_v16 }
 0x2f6   :  { %1618 = vmatmul.msk.f32.gmra.mxu2 %vm176_vm0, %v1213_v9  ;;  %v1214_v2 = vadd.f32 %v1182_v25, %v126_v19 }
 0x2fa   :  { %v471_v54 = vpop.permute.xlu1 %470 }
 0x2fb   :  { %v556_v28 = vsub.f32 %v2818_v48, %v471_v54  ;;  %v127_v48 = vld [vmem:[%s3082_s3 + $0xe0] sm:$0xff]  ;;  %s1682_s3 = smov 8  }
 0x2fc   :  { %v1079_v39 = vpop.permute.xlu0 %1078 }
 0x2fd   :  { %v1165_v38 = vsel %vm1154_vm1, %v556_v28, %v1079_v39 }
 0x2fe   :  { %v1197_v6 = vadd.f32 %v1165_v38, %v109_v44  ;;  %v1374_v41 = vpop.f32.mrf.mxu2  ;;  %1619 = vmatmul.msk.f32.gmra.mxu2 %vm176_vm0, %v1214_v2 }
 0x2ff   :  { %v1442_v46 = vmax.f32 %v1374_v41, 0.0 }
 0x300   :  { %1602 = vmatmul.msk.f32.gmra.mxu0 %vm176_vm0, %v1197_v6 }
 0x302   :  { %v1115_v21 = vpop.permute.xlu1 %1114 }
 0x303   :  { %v1183_v37 = vsel %vm1154_vm1, %v574_v51, %v1115_v21 }
 0x304   :  { %v1215_v12 = vadd.f32 %v1183_v37, %v127_v48  ;;  %v509_v47 = vpop.permute.xlu0 %508  ;;  %v1430_v37 = vmax.f32 %v1338_v29, 0.0  ;;  %v167_v29 = vld [vmem:[%s3085_s6 + $0x18] sm:$0xff] }
 0x305   :  { %v575_v1 = vsub.f32 %v2843_v20, %v509_v47  ;;  %v172_v47 = vld [vmem:[%s3086_s7] sm:$0xff] }
 0x306   :  { %v1377_v53 = vpop.f32.mrf.mxu2  ;;  %1620 = vmatmul.msk.f32.gmra.mxu2 %vm176_vm0, %v1215_v12  ;;  %v1429_v12 = vmax.f32 %v1335_v18, 0.0  ;;  %1462 = vperm.xlu1 %1648, %v172_v47   ;;  %v165_v18 = vld [vmem:[%s3085_s6 + $0x8] sm:$0xff] }
 0x307   :  { %v1443_v17 = vmax.f32 %v1377_v53, 0.0 }
 0x309   :  { %1480 = vmatpush.msrb.mxu3 %v1443_v17  ;;  %v1428_v17 = vmax.f32 %v1332_v7, 0.0 }
 0x30b   :  { %1481 = vmatpush.msrb.mxu3 %v1442_v46  ;;  %v164_v46 = vld [vmem:[%s3085_s6] sm:$0xff] }
 0x30c   :  { %v511_v13 = vpop.permute.xlu0 %510 }
 0x30d   :  { %1482 = vmatpush.msrb.mxu3 %v1441_v5  ;;  %v576_v50 = vsub.f32 %v2854_v31, %v511_v13 }
 0x30e   :  { %v3001_v34 = vpop.f32.mrf.mxu2 }
 0x30f   :  { %1483 = vmatpush.msrb.mxu3 %v1440_v26  ;;  %v166_v26 = vld [vmem:[%s3085_s6 + $0x10] sm:$0xff] }
 0x316   :  { %v3008_v40 = vpop.f32.mrf.mxu2 }
 0x327   :  { %v1117_v33 = vpop.permute.xlu2 %1116 }
 0x328   :  { %v1184_v56 = vsel %vm1154_vm1, %v575_v1, %v1117_v33 }
 0x329   :  { %v1216_v61 = vadd.f32 %v1184_v56, %v128_v11  ;;  %v168_v11 = vld [vmem:[%s3085_s6 + $0x20] sm:$0xff] }
 0x32b   :  { %1621 = vmatmul.msk.f32.gmra.mxu2 %vm176_vm0, %v1216_v61  ;;  %v170_v61 = vld [vmem:[%s3085_s6 + $0x30] sm:$0xff] }
 0x32f   :  { %v513_v45 = vpop.permute.xlu2 %512 }
 0x330   :  { %v577_v43 = vsub.f32 %v2918_v57, %v513_v45  ;;  %v1341_v57 = vpop.f32.mrf.mxu0 }
 0x331   :  { %v1431_v21 = vmax.f32 %v1341_v57, 0.0 }
 0x337   :  { %v1081_v35 = vpop.permute.xlu1 %1080 }
 0x338   :  { %v1166_v62 = vsel %vm1154_vm1, %v557_v24, %v1081_v35  ;;  %v1344_v49 = vpop.f32.mrf.mxu0 }
 0x339   :  { %v1198_v20 = vadd.f32 %v1166_v62, %v110_v14  ;;  %v3011_v30 = vpop.f32.mrf.mxu2  ;;  %v1432_v48 = vmax.f32 %v1344_v49, 0.0  ;;  %v174_v14 = vld [vmem:[%s3086_s7 + $0x10] sm:$0xff] }
 0x33a   :  { %1472 = vperm.xlu0 %1650, %v174_v14   ;;  %v1446_v7 = vmax.f32 %v3011_v30, 0.0 }
 0x33b   :  { %1603 = vmatmul.msk.f32.gmra.mxu0 %vm176_vm0, %v1198_v20 }
 0x340   :  { %v1347_v10 = vpop.f32.mrf.mxu0 }
 0x341   :  { %v3013_v42 = vpop.f32.mrf.mxu2  ;;  %v1433_v51 = vmax.f32 %v1347_v10, 0.0 }
 0x348   :  { %v1350_v3 = vpop.f32.mrf.mxu0 }
 0x349   :  { %v3015_v36 = vpop.f32.mrf.mxu2  ;;  %v1434_v6 = vmax.f32 %v1350_v3, 0.0 }
 0x34f   :  { %v1119_v8 = vpop.permute.xlu1 %1118 }
 0x350   :  { %v1185_v55 = vsel %vm1154_vm1, %v576_v50, %v1119_v8  ;;  %v1353_v0 = vpop.f32.mrf.mxu0  ;;  %v175_v50 = vld [vmem:[%s3086_s7 + $0x18] sm:$0xff] }
 0x351   :  { %v1217_v59 = vadd.f32 %v1185_v55, %v129_v23  ;;  %v3017_v4 = vpop.f32.mrf.mxu2  ;;  %v1435_v27 = vmax.f32 %v1353_v0, 0.0  ;;  %1477 = vperm.xlu1 %1648, %v175_v50  }
 0x353   :  { %1622 = vmatmul.msk.f32.gmra.mxu2 %vm176_vm0, %v1217_v59  ;;  %v173_v59 = vld [vmem:[%s3086_s7 + $0x8] sm:$0xff] }
 0x354   :  { %1467 = vperm.xlu2 %1649, %v173_v59  }
 0x358   :  { %v1356_v16 = vpop.f32.mrf.mxu0 }
 0x359   :  { %v3019_v15 = vpop.f32.mrf.mxu2  ;;  %v1436_v38 = vmax.f32 %v1356_v16, 0.0 }
 0x35a   :  { %v1450_v45 = vmax.f32 %v3019_v15, 0.0 }
 0x35f   :  { %v1121_v31 = vpop.permute.xlu0 %1120 }
 0x360   :  { %v1186_v58 = vsel %vm1154_vm1, %v577_v43, %v1121_v31  ;;  %v1359_v60 = vpop.f32.mrf.mxu0  ;;  %v1449_v43 = vmax.f32 %v3017_v4, 0.0  ;;  %v1447_v31 = vmax.f32 %v3013_v42, 0.0 }
 0x361   :  { %v1218_v52 = vadd.f32 %v1186_v58, %v130_v22  ;;  %v3021_v9 = vpop.f32.mrf.mxu2  ;;  %v1437_v39 = vmax.f32 %v1359_v60, 0.0  ;;  %v1448_v22 = vmax.f32 %v3015_v36, 0.0  ;;  %v1445_v58 = vmax.f32 %v3008_v40, 0.0  ;;  %v169_v40 = vld [vmem:[%s3085_s6 + $0x28] sm:$0xff] }
 0x362   :  { %v1451_v55 = vmax.f32 %v3021_v9, 0.0 }
 0x363   :  { %1623 = vmatmul.msk.f32.gmra.mxu2 %vm176_vm0, %v1218_v52  ;;  %v1444_v52 = vmax.f32 %v3001_v34, 0.0  ;;  %v171_v34 = vld [vmem:[%s3085_s6 + $0x38] sm:$0xff]  ;;  %s1680_s6 = smov [#allocation2]  }
 0x364   :  { %s1546_s2 = sshll.u32 %s1680_s6, 4  ;;  %s1547_s2 = int_to_ptr.vmem [resolvable:$true] %s1546_s2 }
 0x369   :  { %v3023_v63 = vpop.f32.mrf.mxu2 }
 0x36a   :  { %v1452_v8 = vmax.f32 %v3023_v63, 0.0 }
 0x371   :  { %v3025_v19 = vpop.f32.mrf.mxu2 }
 0x372   :  { %v1453_v23 = vmax.f32 %v3025_v19, 0.0 }
 0x378   :  { %v1463_v36 = vpop.permute.xlu1 %1462 }
 0x379   :  { %v3027_v44 = vpop.f32.mrf.mxu2 }
 0x37a   :  { %v1454_v13 = vmax.f32 %v3027_v44, 0.0 }
 0x37d   :  { %v1362_v25 = vpop.f32.mrf.mxu0 }
 0x37e   :  { %v1438_v2 = vmax.f32 %v1362_v25, 0.0 }
 0x381   :  { %v1413_v41 = vpop.f32.mrf.mxu2 }
 0x382   :  { %v1455_v20 = vmax.f32 %v1413_v41, 0.0 }
 0x389   :  { %v1416_v53 = vpop.f32.mrf.mxu2 }
 0x38a   :  { %v1456_v62 = vmax.f32 %v1416_v53, 0.0 }
 0x3ac   :  { %v1473_v63 = vpop.permute.xlu0 %1472 }
 0x3ae   :  { %v1419_v5 = vpop.f32.mrf.mxu2  ;;  %v1468_v15 = vpop.permute.xlu2 %1467 }
 0x3af   :  { %v1457_v35 = vmax.f32 %v1419_v5, 0.0 }
 0x3b8   :  { %v1365_v54 = vpop.f32.mrf.mxu0 }
 0x3b9   :  { %v1439_v28 = vmax.f32 %v1365_v54, 0.0 }
 0x3bb   :  { %1484 = vmatpush.msrb.mxu3 %v1439_v28 }
 0x3bd   :  { %1485 = vmatpush.msrb.mxu3 %v1438_v2 }
 0x3bf   :  { %1486 = vmatpush.msrb.mxu3 %v1437_v39 }
 0x3c1   :  { %1487 = vmatpush.msrb.mxu3 %v1436_v38 }
 0x3c3   :  { %1488 = vmatpush.msrb.mxu3 %v1435_v27  ;;  %v1478_v54 = vpop.permute.xlu1 %1477 }
 0x3c5   :  { %1489 = vmatpush.msrb.mxu3 %v1434_v6 }
 0x3c7   :  { %1490 = vmatpush.msrb.mxu3 %v1433_v51 }
 0x3c9   :  { %1491 = vmatpush.msrb.mxu3 %v1432_v48 }
 0x3cb   :  { %1492 = vmatpush.msrb.mxu3 %v1431_v21 }
 0x3cd   :  { %1493 = vmatpush.msrb.mxu3 %v1430_v37 }
 0x3cf   :  { %1494 = vmatpush.msrb.mxu3 %v1429_v12 }
 0x3d1   :  { %1495 = vmatpush.msrb.mxu3 %v1428_v17 }
 0x3d2   :  { %1496 = vmatmul.f32.vlgmr.msrb.gmra.mxu3 %v164_v46 }
 0x3d6   :  { %v1422_v1 = vpop.f32.mrf.mxu2 }
 0x3d7   :  { %v1458_v24 = vmax.f32 %v1422_v1, 0.0 }
 0x3da   :  { %1499 = vmatmul.f32.gmra.mxu3 %v166_v26 }
 0x3e2   :  { %1502 = vmatmul.f32.gmra.mxu3 %v168_v11 }
 0x3e6   :  { %v1425_v33 = vpop.f32.mrf.mxu2 }
 0x3e7   :  { %v1459_v56 = vmax.f32 %v1425_v33, 0.0 }
 0x3e9   :  { %1509 = vmatpush.msra.mxu0 %v1459_v56  ;;  %1626 = vmatpush.msra.mxu3 %v1459_v56 }
 0x3ea   :  { %1505 = vmatmul.f32.gmra.mxu3 %v170_v61 }
 0x3eb   :  { %1510 = vmatpush.msra.mxu0 %v1458_v24  ;;  %1627 = vmatpush.msra.mxu3 %v1458_v24 }
 0x3ed   :  { %1511 = vmatpush.msra.mxu0 %v1457_v35  ;;  %1628 = vmatpush.msra.mxu3 %v1457_v35 }
 0x3ef   :  { %1512 = vmatpush.msra.mxu0 %v1456_v62  ;;  %1629 = vmatpush.msra.mxu3 %v1456_v62 }
 0x3f1   :  { %1513 = vmatpush.msra.mxu0 %v1455_v20  ;;  %1630 = vmatpush.msra.mxu3 %v1455_v20 }
 0x3f3   :  { %1514 = vmatpush.msra.mxu0 %v1454_v13  ;;  %1631 = vmatpush.msra.mxu3 %v1454_v13 }
 0x3f5   :  { %1515 = vmatpush.msra.mxu0 %v1453_v23  ;;  %1632 = vmatpush.msra.mxu3 %v1453_v23 }
 0x3f7   :  { %1516 = vmatpush.msra.mxu0 %v1452_v8  ;;  %1633 = vmatpush.msra.mxu3 %v1452_v8 }
 0x3f9   :  { %1517 = vmatpush.msra.mxu0 %v1451_v55  ;;  %1634 = vmatpush.msra.mxu3 %v1451_v55 }
 0x3fb   :  { %1518 = vmatpush.msra.mxu0 %v1450_v45  ;;  %1635 = vmatpush.msra.mxu3 %v1450_v45 }
 0x3fd   :  { %1519 = vmatpush.msra.mxu0 %v1449_v43  ;;  %1636 = vmatpush.msra.mxu3 %v1449_v43 }
 0x3ff   :  { %1520 = vmatpush.msra.mxu0 %v1448_v22  ;;  %1637 = vmatpush.msra.mxu3 %v1448_v22 }
 0x401   :  { %1521 = vmatpush.msra.mxu0 %v1447_v31  ;;  %1638 = vmatpush.msra.mxu3 %v1447_v31 }
 0x403   :  { %1522 = vmatpush.msra.mxu0 %v1446_v7  ;;  %1639 = vmatpush.msra.mxu3 %v1446_v7 }
 0x405   :  { %1523 = vmatpush.msra.mxu0 %v1445_v58  ;;  %1640 = vmatpush.msra.mxu3 %v1445_v58 }
 0x407   :  { %1524 = vmatpush.msra.mxu0 %v1444_v52  ;;  %1641 = vmatpush.msra.mxu3 %v1444_v52 }
 0x408   :  { %1525 = vmatmul.f32.vlgmr.msra.gmra.mxu0 %v165_v18  ;;  %1528 = vmatmul.f32.vlgmr.msra.gmra.mxu3 %v167_v29 }
 0x410   :  { %1531 = vmatmul.f32.gmra.mxu3 %v169_v40 }
 0x418   :  { %1534 = vmatmul.f32.gmra.mxu3 %v171_v34 }
 0x455   :  { %v1497_v30 = vpop.f32.mrf.mxu3 }
 0x456   :  { %v1498_v10 = vadd.f32 %v1497_v30, %v1463_v36 }
 0x45d   :  { %v1500_v42 = vpop.f32.mrf.mxu3 }
 0x45e   :  { %v1501_v0 = vadd.f32 %v1500_v42, %v1468_v15 }
 0x465   :  { %v1503_v57 = vpop.f32.mrf.mxu3 }
 0x466   :  { %v1504_v60 = vadd.f32 %v1503_v57, %v1473_v63 }
 0x46d   :  { %v1506_v49 = vpop.f32.mrf.mxu3 }
 0x46e   :  { %v1507_v28 = vadd.f32 %v1506_v49, %v1478_v54 }
 0x485   :  { %v1526_v4 = vpop.f32.mrf.mxu0 }
 0x486   :  { %v1527_v3 = vadd.f32 %v1526_v4, %v1498_v10 }
 0x488   :  { %1538 = vst [vmem:[#allocation2] sm:$0xff] %v1527_v3 }
 0x48b   :  { %v1529_v9 = vpop.f32.mrf.mxu3 }
 0x48c   :  { %v1530_v16 = vadd.f32 %v1529_v9, %v1501_v0 }
 0x48e   :  { %1539 = vst [vmem:[#allocation2 + $0x8] sm:$0xff] %v1530_v16 }
 0x493   :  { %v1532_v19 = vpop.f32.mrf.mxu3 }
 0x494   :  { %v1533_v25 = vadd.f32 %v1532_v19, %v1504_v60 }
 0x496   :  { %1540 = vst [vmem:[#allocation2 + $0x10] sm:$0xff] %v1533_v25 }
 0x49b   :  { %v1535_v44 = vpop.f32.mrf.mxu3 }
 0x49c   :  { %v1536_v2 = vadd.f32 %v1535_v44, %v1507_v28 }
 0x49e   :  { %1541 = vst [vmem:[#allocation2 + $0x18] sm:$0xff] %v1536_v2 }
 0x49f   :  { %1554 = dma.vmem_to_hbm [thread:$0]  %s1547_s2, 512, %s1549_s24, [#allocation3], %s1681_s25, %s1681_s25, %s1682_s3  }
 0x4a0   :  { %1675 = dma.done.wait [#allocation3], 512  }
 0x4a1   :  { %1676 = vsyncadd [#allocation3], 4294966784 }
 0x4a2   :  { %1559 = vsyncpa [#allocation3], 1 }

</bundles_post_ra>
